<compile_context>
chip_gen: v5e
topology: v5e:2x2
jax: 0.10.0
libtpu: 0.0.40
codegen_flags: <defaults>
</compile_context>

<pallas_src>
import functools
import math

import jax
import jax.numpy as jnp
from jax.experimental import pallas as pl
from jax.experimental.pallas import tpu as pltpu


def encoder_kernel(
    x_ref,
    sa1_wqkv, sa1_bqkv, sa1_bk, sa1_bv, sa1_wo, sa1_bo,
    ln11_g, ln11_b,
    mlp1_w1, mlp1_b1, mlp1_w2, mlp1_b2,
    ln12_g, ln12_b,
    sa2_wqkv, sa2_bqkv, sa2_bk, sa2_bv, sa2_wo, sa2_bo,
    ln21_g, ln21_b,
    mlp2_w1, mlp2_b1, mlp2_w2, mlp2_b2,
    ln22_g, ln22_b,
    fin_w, fin_b,
    x2_out_ref, fe_out_ref,
    *, batch, seq, emb, mm_dtype,
):
    B, S, E = batch, seq, emb
    scale = 1.0 / math.sqrt(E)  # host-side constant, no in-kernel rsqrt

    def mm(a, w_t):
        # MXU matmul with f32 accumulation; operands optionally cast to bf16
        # (v6e/v7x). Weights arrive pre-transposed in natural (K, N) layout.
        return jnp.dot(a.astype(mm_dtype), w_t.astype(mm_dtype),
                       preferred_element_type=jnp.float32)

    def layer_norm(h, g_ref, b_ref, eps=1e-5):
        # Stats kept in f32.
        mu = jnp.mean(h, axis=-1, keepdims=True)
        var = jnp.mean((h - mu) ** 2, axis=-1, keepdims=True)
        return (h - mu) * jax.lax.rsqrt(var + eps) * g_ref[...] + b_ref[...]

    def mlp(h, w1_t, b1, w2_t, b2):
        z = jnp.maximum(mm(h, w1_t[...]) + b1[...], 0.0)
        return jnp.maximum(mm(z, w2_t[...]) + b2[...], 0.0)

    def attention(h_flat, w_qkv_t, b_qkv, bias_k, bias_v, w_out_t, b_out):
        # Fused QKV projection: one (B*S, E) @ (E, 3E) MXU pass.
        qkv = mm(h_flat, w_qkv_t[...]) + b_qkv[...]          # (B*S, 3E)
        qkv = qkv.reshape(B, S, 3 * E)                       # S==8: sublane-aligned, no-op relayout
        q = qkv[:, :, :E]
        k = qkv[:, :, E:2 * E]
        v = qkv[:, :, 2 * E:]

        # Batched attention scores. add_bias_kv handled as ONE extra softmax
        # term instead of a sublane concat (keeps tiles (8,128)-aligned).
        scores = jnp.einsum("bqd,bkd->bqk",
                            q.astype(mm_dtype), k.astype(mm_dtype),
                            preferred_element_type=jnp.float32) * scale      # (B,S,S)
        bias_score = jnp.sum(q * bias_k[...], axis=-1, keepdims=True) * scale  # (B,S,1)

        m = jnp.maximum(jnp.max(scores, axis=-1, keepdims=True), bias_score)
        p = jnp.exp(scores - m)                               # (B,S,S)
        p_b = jnp.exp(bias_score - m)                         # (B,S,1)
        denom = jnp.sum(p, axis=-1, keepdims=True) + p_b

        ctx = jnp.einsum("bqk,bkd->bqd",
                         p.astype(mm_dtype), v.astype(mm_dtype),
                         preferred_element_type=jnp.float32)
        ctx = ctx + p_b * bias_v[...]                         # bias-value row contribution
        ctx = ctx * pl.reciprocal(denom, approx=True)         # EUP slot (free-ish)
        ctx = ctx.reshape(B * S, E)
        return mm(ctx, w_out_t[...]) + b_out[...]

    # Fold batch into the matmul M dimension once.
    x_flat = x_ref[...].reshape(B * S, E)

    # ---- block 1 ----
    a1 = attention(x_flat, sa1_wqkv, sa1_bqkv, sa1_bk, sa1_bv, sa1_wo, sa1_bo)
    h1 = layer_norm(a1 + x_flat, ln11_g, ln11_b)
    h1 = layer_norm(mlp(h1, mlp1_w1, mlp1_b1, mlp1_w2, mlp1_b2) + h1, ln12_g, ln12_b)

    # ---- block 2 ----
    a2 = attention(h1, sa2_wqkv, sa2_bqkv, sa2_bk, sa2_bv, sa2_wo, sa2_bo)
    h2 = layer_norm(a2 + h1, ln21_g, ln21_b)
    h2 = layer_norm(mlp(h2, mlp2_w1, mlp2_b1, mlp2_w2, mlp2_b2) + h2, ln22_g, ln22_b)

    # Outputs: normalized sequence (flat) + final embedding projection (flat).
    x2_out_ref[...] = h2
    fe_out_ref[...] = mm(h2, fin_w[...]) + fin_b[...]


def t1_encoder_forward(x, params, *, use_bf16_matmul=False):
    B, S, E = x.shape
    F_dim = params["fin_b"].shape[-1]

    # One-time host-side weight prep: pre-transpose so the kernel consumes every
    # weight in (K, N) layout with zero in-kernel transposes/slices of weights.
    prepared = (
        params["sa1_win"].T, params["sa1_bin"], params["sa1_bk"], params["sa1_bv"],
        params["sa1_wo"].T, params["sa1_bo"],
        params["ln11_g"], params["ln11_b"],
        params["mlp1_w1"].T, params["mlp1_b1"], params["mlp1_w2"].T, params["mlp1_b2"],
        params["ln12_g"], params["ln12_b"],
        params["sa2_win"].T, params["sa2_bin"], params["sa2_bk"], params["sa2_bv"],
        params["sa2_wo"].T, params["sa2_bo"],
        params["ln21_g"], params["ln21_b"],
        params["mlp2_w1"].T, params["mlp2_b1"], params["mlp2_w2"].T, params["mlp2_b2"],
        params["ln22_g"], params["ln22_b"],
        params["fin_w"].T, params["fin_b"],
    )

    kernel = functools.partial(
        encoder_kernel, batch=B, seq=S, emb=E,
        mm_dtype=jnp.bfloat16 if use_bf16_matmul else jnp.float32,
    )

    in_specs = [pl.BlockSpec((B, S, E), lambda i: (0, 0, 0))]
    in_specs += [pl.BlockSpec(p.shape, lambda i: (0, 0)) for p in prepared]  # all params 2D, full blocks
    out_specs = [
        pl.BlockSpec((B * S, E), lambda i: (0, 0)),
        pl.BlockSpec((B * S, F_dim), lambda i: (0, 0)),
    ]

    x2_flat, final_emb = pl.pallas_call(
        kernel,
        out_shape=(
            jax.ShapeDtypeStruct((B * S, E), jnp.float32),
            jax.ShapeDtypeStruct((B * S, F_dim), jnp.float32),
        ),
        grid_spec=pltpu.PrefetchScalarGridSpec(
            num_scalar_prefetch=0,
            grid=(1,),  # single step: whole problem + all weights fit VMEM trivially
            in_specs=in_specs,
            out_specs=out_specs,
        ),
        compiler_params=pltpu.CompilerParams(
            dimension_semantics=("arbitrary",),
            vmem_limit_bytes=32 * 1024 * 1024,  # safe scoped budget on v5e/v6e/v7x
        ),
    )(x, *prepared)

    return x2_flat.reshape(B, S, E), final_emb


def init_params(key, e, f):
    h = e // 2
    shapes = {
        "sa1_win": (3 * e, e), "sa1_bin": (1, 3 * e), "sa1_bk": (1, e), "sa1_bv": (1, e),
        "sa1_wo": (e, e), "sa1_bo": (1, e),
        "ln11_g": (1, e), "ln11_b": (1, e),
        "mlp1_w1": (h, e), "mlp1_b1": (1, h), "mlp1_w2": (e, h), "mlp1_b2": (1, e),
        "ln12_g": (1, e), "ln12_b": (1, e),
        "sa2_win": (3 * e, e), "sa2_bin": (1, 3 * e), "sa2_bk": (1, e), "sa2_bv": (1, e),
        "sa2_wo": (e, e), "sa2_bo": (1, e),
        "ln21_g": (1, e), "ln21_b": (1, e),
        "mlp2_w1": (h, e), "mlp2_b1": (1, h), "mlp2_w2": (e, h), "mlp2_b2": (1, e),
        "ln22_g": (1, e), "ln22_b": (1, e),
        "fin_w": (f, e), "fin_b": (1, f),
    }
    params = {}
    keys = jax.random.split(key, len(shapes))
    for k, name in zip(keys, shapes):
        shp = shapes[name]
        if name.startswith("ln") and name.endswith("_g"):
            params[name] = jnp.ones(shp, jnp.float32)
        elif name.startswith("ln") and name.endswith("_b"):
            params[name] = jnp.zeros(shp, jnp.float32)
        else:
            params[name] = 0.2 * jax.random.normal(k, shp, jnp.float32)
    return params


if __name__ == "__main__":
    # small shapes consistent with the module: (batch, context_len, embedding_len)
    B, S, E, F_OUT = 2, 8, 8, 16

    root = jax.random.PRNGKey(0)
    kx, kp = jax.random.split(root)
    x = jax.random.normal(kx, (B, S, E), dtype=jnp.float32)
    params = init_params(kp, E, F_OUT)

    x2, final_emb = jax.jit(t1_encoder_forward)(x, params)
    jax.block_until_ready((x2, final_emb))

    assert x2.shape == (B, S, E)
    assert final_emb.shape == (B * S, F_OUT)
    print("KERNEL_OK")
</pallas_src>

<mosaic_0001>
module attributes {stable_mosaic.version = 11 : i64} {
  func.func @encoder_kernel(%arg0: i32, %arg1: memref<2x8x8xf32, #tpu.memory_space<vmem>>, %arg2: memref<8x24xf32, #tpu.memory_space<vmem>>, %arg3: memref<1x24xf32, #tpu.memory_space<vmem>>, %arg4: memref<1x8xf32, #tpu.memory_space<vmem>>, %arg5: memref<1x8xf32, #tpu.memory_space<vmem>>, %arg6: memref<8x8xf32, #tpu.memory_space<vmem>>, %arg7: memref<1x8xf32, #tpu.memory_space<vmem>>, %arg8: memref<1x8xf32, #tpu.memory_space<vmem>>, %arg9: memref<1x8xf32, #tpu.memory_space<vmem>>, %arg10: memref<8x4xf32, #tpu.memory_space<vmem>>, %arg11: memref<1x4xf32, #tpu.memory_space<vmem>>, %arg12: memref<4x8xf32, #tpu.memory_space<vmem>>, %arg13: memref<1x8xf32, #tpu.memory_space<vmem>>, %arg14: memref<1x8xf32, #tpu.memory_space<vmem>>, %arg15: memref<1x8xf32, #tpu.memory_space<vmem>>, %arg16: memref<8x24xf32, #tpu.memory_space<vmem>>, %arg17: memref<1x24xf32, #tpu.memory_space<vmem>>, %arg18: memref<1x8xf32, #tpu.memory_space<vmem>>, %arg19: memref<1x8xf32, #tpu.memory_space<vmem>>, %arg20: memref<8x8xf32, #tpu.memory_space<vmem>>, %arg21: memref<1x8xf32, #tpu.memory_space<vmem>>, %arg22: memref<1x8xf32, #tpu.memory_space<vmem>>, %arg23: memref<1x8xf32, #tpu.memory_space<vmem>>, %arg24: memref<8x4xf32, #tpu.memory_space<vmem>>, %arg25: memref<1x4xf32, #tpu.memory_space<vmem>>, %arg26: memref<4x8xf32, #tpu.memory_space<vmem>>, %arg27: memref<1x8xf32, #tpu.memory_space<vmem>>, %arg28: memref<1x8xf32, #tpu.memory_space<vmem>>, %arg29: memref<1x8xf32, #tpu.memory_space<vmem>>, %arg30: memref<8x16xf32, #tpu.memory_space<vmem>>, %arg31: memref<1x16xf32, #tpu.memory_space<vmem>>, %arg32: memref<16x8xf32, #tpu.memory_space<vmem>>, %arg33: memref<16x16xf32, #tpu.memory_space<vmem>>) attributes {dimension_semantics = [#tpu.dimension_semantics<arbitrary>], iteration_bounds = array<i64: 1>, scalar_prefetch = 0 : i64, scratch_operands = 0 : i64, tpu.core_type = #tpu.core_type<tc>, window_params = [{pipeline_mode = #tpu.pipeline_mode<synchronous>, transform_indices = @transform_0, window_bounds = array<i64: 2, 8, 8>}, {pipeline_mode = #tpu.pipeline_mode<synchronous>, transform_indices = @transform_1, window_bounds = array<i64: 8, 24>}, {pipeline_mode = #tpu.pipeline_mode<synchronous>, transform_indices = @transform_2, window_bounds = array<i64: 1, 24>}, {pipeline_mode = #tpu.pipeline_mode<synchronous>, transform_indices = @transform_3, window_bounds = array<i64: 1, 8>}, {pipeline_mode = #tpu.pipeline_mode<synchronous>, transform_indices = @transform_4, window_bounds = array<i64: 1, 8>}, {pipeline_mode = #tpu.pipeline_mode<synchronous>, transform_indices = @transform_5, window_bounds = array<i64: 8, 8>}, {pipeline_mode = #tpu.pipeline_mode<synchronous>, transform_indices = @transform_6, window_bounds = array<i64: 1, 8>}, {pipeline_mode = #tpu.pipeline_mode<synchronous>, transform_indices = @transform_7, window_bounds = array<i64: 1, 8>}, {pipeline_mode = #tpu.pipeline_mode<synchronous>, transform_indices = @transform_8, window_bounds = array<i64: 1, 8>}, {pipeline_mode = #tpu.pipeline_mode<synchronous>, transform_indices = @transform_9, window_bounds = array<i64: 8, 4>}, {pipeline_mode = #tpu.pipeline_mode<synchronous>, transform_indices = @transform_10, window_bounds = array<i64: 1, 4>}, {pipeline_mode = #tpu.pipeline_mode<synchronous>, transform_indices = @transform_11, window_bounds = array<i64: 4, 8>}, {pipeline_mode = #tpu.pipeline_mode<synchronous>, transform_indices = @transform_12, window_bounds = array<i64: 1, 8>}, {pipeline_mode = #tpu.pipeline_mode<synchronous>, transform_indices = @transform_13, window_bounds = array<i64: 1, 8>}, {pipeline_mode = #tpu.pipeline_mode<synchronous>, transform_indices = @transform_14, window_bounds = array<i64: 1, 8>}, {pipeline_mode = #tpu.pipeline_mode<synchronous>, transform_indices = @transform_15, window_bounds = array<i64: 8, 24>}, {pipeline_mode = #tpu.pipeline_mode<synchronous>, transform_indices = @transform_16, window_bounds = array<i64: 1, 24>}, {pipeline_mode = #tpu.pipeline_mode<synchronous>, transform_indices = @transform_17, window_bounds = array<i64: 1, 8>}, {pipeline_mode = #tpu.pipeline_mode<synchronous>, transform_indices = @transform_18, window_bounds = array<i64: 1, 8>}, {pipeline_mode = #tpu.pipeline_mode<synchronous>, transform_indices = @transform_19, window_bounds = array<i64: 8, 8>}, {pipeline_mode = #tpu.pipeline_mode<synchronous>, transform_indices = @transform_20, window_bounds = array<i64: 1, 8>}, {pipeline_mode = #tpu.pipeline_mode<synchronous>, transform_indices = @transform_21, window_bounds = array<i64: 1, 8>}, {pipeline_mode = #tpu.pipeline_mode<synchronous>, transform_indices = @transform_22, window_bounds = array<i64: 1, 8>}, {pipeline_mode = #tpu.pipeline_mode<synchronous>, transform_indices = @transform_23, window_bounds = array<i64: 8, 4>}, {pipeline_mode = #tpu.pipeline_mode<synchronous>, transform_indices = @transform_24, window_bounds = array<i64: 1, 4>}, {pipeline_mode = #tpu.pipeline_mode<synchronous>, transform_indices = @transform_25, window_bounds = array<i64: 4, 8>}, {pipeline_mode = #tpu.pipeline_mode<synchronous>, transform_indices = @transform_26, window_bounds = array<i64: 1, 8>}, {pipeline_mode = #tpu.pipeline_mode<synchronous>, transform_indices = @transform_27, window_bounds = array<i64: 1, 8>}, {pipeline_mode = #tpu.pipeline_mode<synchronous>, transform_indices = @transform_28, window_bounds = array<i64: 1, 8>}, {pipeline_mode = #tpu.pipeline_mode<synchronous>, transform_indices = @transform_29, window_bounds = array<i64: 8, 16>}, {pipeline_mode = #tpu.pipeline_mode<synchronous>, transform_indices = @transform_30, window_bounds = array<i64: 1, 16>}, {pipeline_mode = #tpu.pipeline_mode<synchronous>, transform_indices = @transform_31, window_bounds = array<i64: 16, 8>}, {pipeline_mode = #tpu.pipeline_mode<synchronous>, transform_indices = @transform_32, window_bounds = array<i64: 16, 16>}]} {
    %c0 = arith.constant 0 : index
    %c0_0 = arith.constant 0 : index
    %c0_1 = arith.constant 0 : index
    %0 = vector.load %arg1[%c0, %c0_0, %c0_1] : memref<2x8x8xf32, #tpu.memory_space<vmem>>, vector<2x8x8xf32>
    %1 = vector.shape_cast %0 : vector<2x8x8xf32> to vector<16x8xf32>
    %c0_2 = arith.constant 0 : index
    %c0_3 = arith.constant 0 : index
    %2 = vector.load %arg2[%c0_2, %c0_3] : memref<8x24xf32, #tpu.memory_space<vmem>>, vector<8x24xf32>
    %cst = arith.constant dense<0.000000e+00> : vector<16x24xf32>
    %3 = tpu.matmul %1, %2, %cst {dimension_numbers = #tpu.dot_dimension_numbers<[1], [0], [0], [1], [0, 0, 1, 1], [], []>} : vector<16x8xf32>, vector<8x24xf32>, vector<16x24xf32> -> vector<16x24xf32>
    %c0_4 = arith.constant 0 : index
    %c0_5 = arith.constant 0 : index
    %4 = vector.load %arg3[%c0_4, %c0_5] : memref<1x24xf32, #tpu.memory_space<vmem>>, vector<1x24xf32>
    %5 = vector.broadcast %4 : vector<1x24xf32> to vector<16x24xf32>
    %6 = arith.addf %3, %5 : vector<16x24xf32>
    %7 = vector.shape_cast %6 : vector<16x24xf32> to vector<2x8x24xf32>
    %8 = vector.extract_strided_slice %7 {offsets = [0, 0, 0], sizes = [2, 8, 8], strides = [1, 1, 1]} : vector<2x8x24xf32> to vector<2x8x8xf32>
    %9 = vector.extract_strided_slice %7 {offsets = [0, 0, 8], sizes = [2, 8, 8], strides = [1, 1, 1]} : vector<2x8x24xf32> to vector<2x8x8xf32>
    %10 = vector.extract_strided_slice %7 {offsets = [0, 0, 16], sizes = [2, 8, 8], strides = [1, 1, 1]} : vector<2x8x24xf32> to vector<2x8x8xf32>
    "tpu.trace_start"() <{level = 10 : i32, message = "bqd,bkd->bqk"}> : () -> ()
    %cst_6 = arith.constant dense<0.000000e+00> : vector<2x8x8xf32>
    %11 = tpu.matmul %8, %9, %cst_6 {dimension_numbers = #tpu.dot_dimension_numbers<[2], [2], [1], [1], [0, 0, 0, 1, 1, 1], [0], [0]>} : vector<2x8x8xf32>, vector<2x8x8xf32>, vector<2x8x8xf32> -> vector<2x8x8xf32>
    "tpu.trace_stop"() : () -> ()
    %cst_7 = arith.constant 0.353553385 : f32
    %12 = vector.broadcast %cst_7 : f32 to vector<2x8x8xf32>
    %13 = arith.mulf %11, %12 : vector<2x8x8xf32>
    %c0_8 = arith.constant 0 : index
    %c0_9 = arith.constant 0 : index
    %14 = vector.load %arg4[%c0_8, %c0_9] : memref<1x8xf32, #tpu.memory_space<vmem>>, vector<1x8xf32>
    %15 = vector.shape_cast %14 : vector<1x8xf32> to vector<1x1x8xf32>
    %16 = vector.broadcast %15 : vector<1x1x8xf32> to vector<2x8x8xf32>
    %17 = arith.mulf %8, %16 : vector<2x8x8xf32>
    %cst_10 = arith.constant dense<0.000000e+00> : vector<2x8xf32>
    %18 = vector.multi_reduction <add>, %17, %cst_10 [2] : vector<2x8x8xf32> to vector<2x8xf32>
    %19 = vector.shape_cast %18 : vector<2x8xf32> to vector<2x8x1xf32>
    %cst_11 = arith.constant 0.353553385 : f32
    %20 = vector.broadcast %cst_11 : f32 to vector<2x8x1xf32>
    %21 = arith.mulf %19, %20 : vector<2x8x1xf32>
    %cst_12 = arith.constant dense<0xFF800000> : vector<2x8xf32>
    %22 = vector.multi_reduction <maximumf>, %13, %cst_12 [2] : vector<2x8x8xf32> to vector<2x8xf32>
    %23 = vector.shape_cast %22 : vector<2x8xf32> to vector<2x8x1xf32>
    %24 = arith.maximumf %23, %21 : vector<2x8x1xf32>
    %25 = vector.broadcast %24 : vector<2x8x1xf32> to vector<2x8x8xf32>
    %26 = arith.subf %13, %25 : vector<2x8x8xf32>
    %27 = math.exp %26 : vector<2x8x8xf32>
    %28 = arith.subf %21, %24 : vector<2x8x1xf32>
    %29 = math.exp %28 : vector<2x8x1xf32>
    %cst_13 = arith.constant dense<0.000000e+00> : vector<2x8xf32>
    %30 = vector.multi_reduction <add>, %27, %cst_13 [2] : vector<2x8x8xf32> to vector<2x8xf32>
    %31 = vector.shape_cast %30 : vector<2x8xf32> to vector<2x8x1xf32>
    %32 = arith.addf %31, %29 : vector<2x8x1xf32>
    "tpu.trace_start"() <{level = 10 : i32, message = "bqk,bkd->bqd"}> : () -> ()
    %cst_14 = arith.constant dense<0.000000e+00> : vector<2x8x8xf32>
    %33 = tpu.matmul %27, %10, %cst_14 {dimension_numbers = #tpu.dot_dimension_numbers<[2], [1], [1], [2], [0, 0, 0, 1, 1, 2], [0], [0]>} : vector<2x8x8xf32>, vector<2x8x8xf32>, vector<2x8x8xf32> -> vector<2x8x8xf32>
    "tpu.trace_stop"() : () -> ()
    %c0_15 = arith.constant 0 : index
    %c0_16 = arith.constant 0 : index
    %34 = vector.load %arg5[%c0_15, %c0_16] : memref<1x8xf32, #tpu.memory_space<vmem>>, vector<1x8xf32>
    %35 = vector.shape_cast %34 : vector<1x8xf32> to vector<1x1x8xf32>
    %36 = vector.broadcast %29 : vector<2x8x1xf32> to vector<2x8x8xf32>
    %37 = vector.broadcast %35 : vector<1x1x8xf32> to vector<2x8x8xf32>
    %38 = arith.mulf %36, %37 : vector<2x8x8xf32>
    %39 = arith.addf %33, %38 : vector<2x8x8xf32>
    %40 = tpu.reciprocal %32 {approx = true} : vector<2x8x1xf32> -> vector<2x8x1xf32>
    %41 = vector.broadcast %40 : vector<2x8x1xf32> to vector<2x8x8xf32>
    %42 = arith.mulf %39, %41 : vector<2x8x8xf32>
    %43 = vector.shape_cast %42 : vector<2x8x8xf32> to vector<16x8xf32>
    %c0_17 = arith.constant 0 : index
    %c0_18 = arith.constant 0 : index
    %44 = vector.load %arg6[%c0_17, %c0_18] : memref<8x8xf32, #tpu.memory_space<vmem>>, vector<8x8xf32>
    %cst_19 = arith.constant dense<0.000000e+00> : vector<16x8xf32>
    %45 = tpu.matmul %43, %44, %cst_19 {dimension_numbers = #tpu.dot_dimension_numbers<[1], [0], [0], [1], [0, 0, 1, 1], [], []>} : vector<16x8xf32>, vector<8x8xf32>, vector<16x8xf32> -> vector<16x8xf32>
    %c0_20 = arith.constant 0 : index
    %c0_21 = arith.constant 0 : index
    %46 = vector.load %arg7[%c0_20, %c0_21] : memref<1x8xf32, #tpu.memory_space<vmem>>, vector<1x8xf32>
    %47 = vector.broadcast %46 : vector<1x8xf32> to vector<16x8xf32>
    %48 = arith.addf %45, %47 : vector<16x8xf32>
    %49 = arith.addf %48, %1 : vector<16x8xf32>
    %cst_22 = arith.constant dense<0.000000e+00> : vector<16xf32>
    %50 = vector.multi_reduction <add>, %49, %cst_22 [1] : vector<16x8xf32> to vector<16xf32>
    %51 = vector.shape_cast %50 : vector<16xf32> to vector<16x1xf32>
    %cst_23 = arith.constant 8.000000e+00 : f32
    %52 = vector.broadcast %cst_23 : f32 to vector<16x1xf32>
    %53 = arith.divf %51, %52 : vector<16x1xf32>
    %54 = vector.broadcast %53 : vector<16x1xf32> to vector<16x8xf32>
    %55 = arith.subf %49, %54 : vector<16x8xf32>
    %56 = arith.mulf %55, %55 : vector<16x8xf32>
    %cst_24 = arith.constant dense<0.000000e+00> : vector<16xf32>
    %57 = vector.multi_reduction <add>, %56, %cst_24 [1] : vector<16x8xf32> to vector<16xf32>
    %58 = vector.shape_cast %57 : vector<16xf32> to vector<16x1xf32>
    %cst_25 = arith.constant 8.000000e+00 : f32
    %59 = vector.broadcast %cst_25 : f32 to vector<16x1xf32>
    %60 = arith.divf %58, %59 : vector<16x1xf32>
    %61 = vector.broadcast %53 : vector<16x1xf32> to vector<16x8xf32>
    %62 = arith.subf %49, %61 : vector<16x8xf32>
    %cst_26 = arith.constant 9.99999974E-6 : f32
    %63 = vector.broadcast %cst_26 : f32 to vector<16x1xf32>
    %64 = arith.addf %60, %63 : vector<16x1xf32>
    %65 = math.rsqrt %64 : vector<16x1xf32>
    %66 = vector.broadcast %65 : vector<16x1xf32> to vector<16x8xf32>
    %67 = arith.mulf %62, %66 : vector<16x8xf32>
    %c0_27 = arith.constant 0 : index
    %c0_28 = arith.constant 0 : index
    %68 = vector.load %arg8[%c0_27, %c0_28] : memref<1x8xf32, #tpu.memory_space<vmem>>, vector<1x8xf32>
    %69 = vector.broadcast %68 : vector<1x8xf32> to vector<16x8xf32>
    %70 = arith.mulf %67, %69 : vector<16x8xf32>
    %c0_29 = arith.constant 0 : index
    %c0_30 = arith.constant 0 : index
    %71 = vector.load %arg9[%c0_29, %c0_30] : memref<1x8xf32, #tpu.memory_space<vmem>>, vector<1x8xf32>
    %72 = vector.broadcast %71 : vector<1x8xf32> to vector<16x8xf32>
    %73 = arith.addf %70, %72 : vector<16x8xf32>
    %c0_31 = arith.constant 0 : index
    %c0_32 = arith.constant 0 : index
    %74 = vector.load %arg10[%c0_31, %c0_32] : memref<8x4xf32, #tpu.memory_space<vmem>>, vector<8x4xf32>
    %cst_33 = arith.constant dense<0.000000e+00> : vector<16x4xf32>
    %75 = tpu.matmul %73, %74, %cst_33 {dimension_numbers = #tpu.dot_dimension_numbers<[1], [0], [0], [1], [0, 0, 1, 1], [], []>} : vector<16x8xf32>, vector<8x4xf32>, vector<16x4xf32> -> vector<16x4xf32>
    %c0_34 = arith.constant 0 : index
    %c0_35 = arith.constant 0 : index
    %76 = vector.load %arg11[%c0_34, %c0_35] : memref<1x4xf32, #tpu.memory_space<vmem>>, vector<1x4xf32>
    %77 = vector.broadcast %76 : vector<1x4xf32> to vector<16x4xf32>
    %78 = arith.addf %75, %77 : vector<16x4xf32>
    %cst_36 = arith.constant 0.000000e+00 : f32
    %79 = vector.broadcast %cst_36 : f32 to vector<16x4xf32>
    %80 = arith.maximumf %78, %79 : vector<16x4xf32>
    %c0_37 = arith.constant 0 : index
    %c0_38 = arith.constant 0 : index
    %81 = vector.load %arg12[%c0_37, %c0_38] : memref<4x8xf32, #tpu.memory_space<vmem>>, vector<4x8xf32>
    %cst_39 = arith.constant dense<0.000000e+00> : vector<16x8xf32>
    %82 = tpu.matmul %80, %81, %cst_39 {dimension_numbers = #tpu.dot_dimension_numbers<[1], [0], [0], [1], [0, 0, 1, 1], [], []>} : vector<16x4xf32>, vector<4x8xf32>, vector<16x8xf32> -> vector<16x8xf32>
    %c0_40 = arith.constant 0 : index
    %c0_41 = arith.constant 0 : index
    %83 = vector.load %arg13[%c0_40, %c0_41] : memref<1x8xf32, #tpu.memory_space<vmem>>, vector<1x8xf32>
    %84 = vector.broadcast %83 : vector<1x8xf32> to vector<16x8xf32>
    %85 = arith.addf %82, %84 : vector<16x8xf32>
    %cst_42 = arith.constant 0.000000e+00 : f32
    %86 = vector.broadcast %cst_42 : f32 to vector<16x8xf32>
    %87 = arith.maximumf %85, %86 : vector<16x8xf32>
    %88 = arith.addf %87, %73 : vector<16x8xf32>
    %cst_43 = arith.constant dense<0.000000e+00> : vector<16xf32>
    %89 = vector.multi_reduction <add>, %88, %cst_43 [1] : vector<16x8xf32> to vector<16xf32>
    %90 = vector.shape_cast %89 : vector<16xf32> to vector<16x1xf32>
    %cst_44 = arith.constant 8.000000e+00 : f32
    %91 = vector.broadcast %cst_44 : f32 to vector<16x1xf32>
    %92 = arith.divf %90, %91 : vector<16x1xf32>
    %93 = vector.broadcast %92 : vector<16x1xf32> to vector<16x8xf32>
    %94 = arith.subf %88, %93 : vector<16x8xf32>
    %95 = arith.mulf %94, %94 : vector<16x8xf32>
    %cst_45 = arith.constant dense<0.000000e+00> : vector<16xf32>
    %96 = vector.multi_reduction <add>, %95, %cst_45 [1] : vector<16x8xf32> to vector<16xf32>
    %97 = vector.shape_cast %96 : vector<16xf32> to vector<16x1xf32>
    %cst_46 = arith.constant 8.000000e+00 : f32
    %98 = vector.broadcast %cst_46 : f32 to vector<16x1xf32>
    %99 = arith.divf %97, %98 : vector<16x1xf32>
    %100 = vector.broadcast %92 : vector<16x1xf32> to vector<16x8xf32>
    %101 = arith.subf %88, %100 : vector<16x8xf32>
    %cst_47 = arith.constant 9.99999974E-6 : f32
    %102 = vector.broadcast %cst_47 : f32 to vector<16x1xf32>
    %103 = arith.addf %99, %102 : vector<16x1xf32>
    %104 = math.rsqrt %103 : vector<16x1xf32>
    %105 = vector.broadcast %104 : vector<16x1xf32> to vector<16x8xf32>
    %106 = arith.mulf %101, %105 : vector<16x8xf32>
    %c0_48 = arith.constant 0 : index
    %c0_49 = arith.constant 0 : index
    %107 = vector.load %arg14[%c0_48, %c0_49] : memref<1x8xf32, #tpu.memory_space<vmem>>, vector<1x8xf32>
    %108 = vector.broadcast %107 : vector<1x8xf32> to vector<16x8xf32>
    %109 = arith.mulf %106, %108 : vector<16x8xf32>
    %c0_50 = arith.constant 0 : index
    %c0_51 = arith.constant 0 : index
    %110 = vector.load %arg15[%c0_50, %c0_51] : memref<1x8xf32, #tpu.memory_space<vmem>>, vector<1x8xf32>
    %111 = vector.broadcast %110 : vector<1x8xf32> to vector<16x8xf32>
    %112 = arith.addf %109, %111 : vector<16x8xf32>
    %c0_52 = arith.constant 0 : index
    %c0_53 = arith.constant 0 : index
    %113 = vector.load %arg16[%c0_52, %c0_53] : memref<8x24xf32, #tpu.memory_space<vmem>>, vector<8x24xf32>
    %cst_54 = arith.constant dense<0.000000e+00> : vector<16x24xf32>
    %114 = tpu.matmul %112, %113, %cst_54 {dimension_numbers = #tpu.dot_dimension_numbers<[1], [0], [0], [1], [0, 0, 1, 1], [], []>} : vector<16x8xf32>, vector<8x24xf32>, vector<16x24xf32> -> vector<16x24xf32>
    %c0_55 = arith.constant 0 : index
    %c0_56 = arith.constant 0 : index
    %115 = vector.load %arg17[%c0_55, %c0_56] : memref<1x24xf32, #tpu.memory_space<vmem>>, vector<1x24xf32>
    %116 = vector.broadcast %115 : vector<1x24xf32> to vector<16x24xf32>
    %117 = arith.addf %114, %116 : vector<16x24xf32>
    %118 = vector.shape_cast %117 : vector<16x24xf32> to vector<2x8x24xf32>
    %119 = vector.extract_strided_slice %118 {offsets = [0, 0, 0], sizes = [2, 8, 8], strides = [1, 1, 1]} : vector<2x8x24xf32> to vector<2x8x8xf32>
    %120 = vector.extract_strided_slice %118 {offsets = [0, 0, 8], sizes = [2, 8, 8], strides = [1, 1, 1]} : vector<2x8x24xf32> to vector<2x8x8xf32>
    %121 = vector.extract_strided_slice %118 {offsets = [0, 0, 16], sizes = [2, 8, 8], strides = [1, 1, 1]} : vector<2x8x24xf32> to vector<2x8x8xf32>
    "tpu.trace_start"() <{level = 10 : i32, message = "bqd,bkd->bqk"}> : () -> ()
    %cst_57 = arith.constant dense<0.000000e+00> : vector<2x8x8xf32>
    %122 = tpu.matmul %119, %120, %cst_57 {dimension_numbers = #tpu.dot_dimension_numbers<[2], [2], [1], [1], [0, 0, 0, 1, 1, 1], [0], [0]>} : vector<2x8x8xf32>, vector<2x8x8xf32>, vector<2x8x8xf32> -> vector<2x8x8xf32>
    "tpu.trace_stop"() : () -> ()
    %cst_58 = arith.constant 0.353553385 : f32
    %123 = vector.broadcast %cst_58 : f32 to vector<2x8x8xf32>
    %124 = arith.mulf %122, %123 : vector<2x8x8xf32>
    %c0_59 = arith.constant 0 : index
    %c0_60 = arith.constant 0 : index
    %125 = vector.load %arg18[%c0_59, %c0_60] : memref<1x8xf32, #tpu.memory_space<vmem>>, vector<1x8xf32>
    %126 = vector.shape_cast %125 : vector<1x8xf32> to vector<1x1x8xf32>
    %127 = vector.broadcast %126 : vector<1x1x8xf32> to vector<2x8x8xf32>
    %128 = arith.mulf %119, %127 : vector<2x8x8xf32>
    %cst_61 = arith.constant dense<0.000000e+00> : vector<2x8xf32>
    %129 = vector.multi_reduction <add>, %128, %cst_61 [2] : vector<2x8x8xf32> to vector<2x8xf32>
    %130 = vector.shape_cast %129 : vector<2x8xf32> to vector<2x8x1xf32>
    %cst_62 = arith.constant 0.353553385 : f32
    %131 = vector.broadcast %cst_62 : f32 to vector<2x8x1xf32>
    %132 = arith.mulf %130, %131 : vector<2x8x1xf32>
    %cst_63 = arith.constant dense<0xFF800000> : vector<2x8xf32>
    %133 = vector.multi_reduction <maximumf>, %124, %cst_63 [2] : vector<2x8x8xf32> to vector<2x8xf32>
    %134 = vector.shape_cast %133 : vector<2x8xf32> to vector<2x8x1xf32>
    %135 = arith.maximumf %134, %132 : vector<2x8x1xf32>
    %136 = vector.broadcast %135 : vector<2x8x1xf32> to vector<2x8x8xf32>
    %137 = arith.subf %124, %136 : vector<2x8x8xf32>
    %138 = math.exp %137 : vector<2x8x8xf32>
    %139 = arith.subf %132, %135 : vector<2x8x1xf32>
    %140 = math.exp %139 : vector<2x8x1xf32>
    %cst_64 = arith.constant dense<0.000000e+00> : vector<2x8xf32>
    %141 = vector.multi_reduction <add>, %138, %cst_64 [2] : vector<2x8x8xf32> to vector<2x8xf32>
    %142 = vector.shape_cast %141 : vector<2x8xf32> to vector<2x8x1xf32>
    %143 = arith.addf %142, %140 : vector<2x8x1xf32>
    "tpu.trace_start"() <{level = 10 : i32, message = "bqk,bkd->bqd"}> : () -> ()
    %cst_65 = arith.constant dense<0.000000e+00> : vector<2x8x8xf32>
    %144 = tpu.matmul %138, %121, %cst_65 {dimension_numbers = #tpu.dot_dimension_numbers<[2], [1], [1], [2], [0, 0, 0, 1, 1, 2], [0], [0]>} : vector<2x8x8xf32>, vector<2x8x8xf32>, vector<2x8x8xf32> -> vector<2x8x8xf32>
    "tpu.trace_stop"() : () -> ()
    %c0_66 = arith.constant 0 : index
    %c0_67 = arith.constant 0 : index
    %145 = vector.load %arg19[%c0_66, %c0_67] : memref<1x8xf32, #tpu.memory_space<vmem>>, vector<1x8xf32>
    %146 = vector.shape_cast %145 : vector<1x8xf32> to vector<1x1x8xf32>
    %147 = vector.broadcast %140 : vector<2x8x1xf32> to vector<2x8x8xf32>
    %148 = vector.broadcast %146 : vector<1x1x8xf32> to vector<2x8x8xf32>
    %149 = arith.mulf %147, %148 : vector<2x8x8xf32>
    %150 = arith.addf %144, %149 : vector<2x8x8xf32>
    %151 = tpu.reciprocal %143 {approx = true} : vector<2x8x1xf32> -> vector<2x8x1xf32>
    %152 = vector.broadcast %151 : vector<2x8x1xf32> to vector<2x8x8xf32>
    %153 = arith.mulf %150, %152 : vector<2x8x8xf32>
    %154 = vector.shape_cast %153 : vector<2x8x8xf32> to vector<16x8xf32>
    %c0_68 = arith.constant 0 : index
    %c0_69 = arith.constant 0 : index
    %155 = vector.load %arg20[%c0_68, %c0_69] : memref<8x8xf32, #tpu.memory_space<vmem>>, vector<8x8xf32>
    %cst_70 = arith.constant dense<0.000000e+00> : vector<16x8xf32>
    %156 = tpu.matmul %154, %155, %cst_70 {dimension_numbers = #tpu.dot_dimension_numbers<[1], [0], [0], [1], [0, 0, 1, 1], [], []>} : vector<16x8xf32>, vector<8x8xf32>, vector<16x8xf32> -> vector<16x8xf32>
    %c0_71 = arith.constant 0 : index
    %c0_72 = arith.constant 0 : index
    %157 = vector.load %arg21[%c0_71, %c0_72] : memref<1x8xf32, #tpu.memory_space<vmem>>, vector<1x8xf32>
    %158 = vector.broadcast %157 : vector<1x8xf32> to vector<16x8xf32>
    %159 = arith.addf %156, %158 : vector<16x8xf32>
    %160 = arith.addf %159, %112 : vector<16x8xf32>
    %cst_73 = arith.constant dense<0.000000e+00> : vector<16xf32>
    %161 = vector.multi_reduction <add>, %160, %cst_73 [1] : vector<16x8xf32> to vector<16xf32>
    %162 = vector.shape_cast %161 : vector<16xf32> to vector<16x1xf32>
    %cst_74 = arith.constant 8.000000e+00 : f32
    %163 = vector.broadcast %cst_74 : f32 to vector<16x1xf32>
    %164 = arith.divf %162, %163 : vector<16x1xf32>
    %165 = vector.broadcast %164 : vector<16x1xf32> to vector<16x8xf32>
    %166 = arith.subf %160, %165 : vector<16x8xf32>
    %167 = arith.mulf %166, %166 : vector<16x8xf32>
    %cst_75 = arith.constant dense<0.000000e+00> : vector<16xf32>
    %168 = vector.multi_reduction <add>, %167, %cst_75 [1] : vector<16x8xf32> to vector<16xf32>
    %169 = vector.shape_cast %168 : vector<16xf32> to vector<16x1xf32>
    %cst_76 = arith.constant 8.000000e+00 : f32
    %170 = vector.broadcast %cst_76 : f32 to vector<16x1xf32>
    %171 = arith.divf %169, %170 : vector<16x1xf32>
    %172 = vector.broadcast %164 : vector<16x1xf32> to vector<16x8xf32>
    %173 = arith.subf %160, %172 : vector<16x8xf32>
    %cst_77 = arith.constant 9.99999974E-6 : f32
    %174 = vector.broadcast %cst_77 : f32 to vector<16x1xf32>
    %175 = arith.addf %171, %174 : vector<16x1xf32>
    %176 = math.rsqrt %175 : vector<16x1xf32>
    %177 = vector.broadcast %176 : vector<16x1xf32> to vector<16x8xf32>
    %178 = arith.mulf %173, %177 : vector<16x8xf32>
    %c0_78 = arith.constant 0 : index
    %c0_79 = arith.constant 0 : index
    %179 = vector.load %arg22[%c0_78, %c0_79] : memref<1x8xf32, #tpu.memory_space<vmem>>, vector<1x8xf32>
    %180 = vector.broadcast %179 : vector<1x8xf32> to vector<16x8xf32>
    %181 = arith.mulf %178, %180 : vector<16x8xf32>
    %c0_80 = arith.constant 0 : index
    %c0_81 = arith.constant 0 : index
    %182 = vector.load %arg23[%c0_80, %c0_81] : memref<1x8xf32, #tpu.memory_space<vmem>>, vector<1x8xf32>
    %183 = vector.broadcast %182 : vector<1x8xf32> to vector<16x8xf32>
    %184 = arith.addf %181, %183 : vector<16x8xf32>
    %c0_82 = arith.constant 0 : index
    %c0_83 = arith.constant 0 : index
    %185 = vector.load %arg24[%c0_82, %c0_83] : memref<8x4xf32, #tpu.memory_space<vmem>>, vector<8x4xf32>
    %cst_84 = arith.constant dense<0.000000e+00> : vector<16x4xf32>
    %186 = tpu.matmul %184, %185, %cst_84 {dimension_numbers = #tpu.dot_dimension_numbers<[1], [0], [0], [1], [0, 0, 1, 1], [], []>} : vector<16x8xf32>, vector<8x4xf32>, vector<16x4xf32> -> vector<16x4xf32>
    %c0_85 = arith.constant 0 : index
    %c0_86 = arith.constant 0 : index
    %187 = vector.load %arg25[%c0_85, %c0_86] : memref<1x4xf32, #tpu.memory_space<vmem>>, vector<1x4xf32>
    %188 = vector.broadcast %187 : vector<1x4xf32> to vector<16x4xf32>
    %189 = arith.addf %186, %188 : vector<16x4xf32>
    %cst_87 = arith.constant 0.000000e+00 : f32
    %190 = vector.broadcast %cst_87 : f32 to vector<16x4xf32>
    %191 = arith.maximumf %189, %190 : vector<16x4xf32>
    %c0_88 = arith.constant 0 : index
    %c0_89 = arith.constant 0 : index
    %192 = vector.load %arg26[%c0_88, %c0_89] : memref<4x8xf32, #tpu.memory_space<vmem>>, vector<4x8xf32>
    %cst_90 = arith.constant dense<0.000000e+00> : vector<16x8xf32>
    %193 = tpu.matmul %191, %192, %cst_90 {dimension_numbers = #tpu.dot_dimension_numbers<[1], [0], [0], [1], [0, 0, 1, 1], [], []>} : vector<16x4xf32>, vector<4x8xf32>, vector<16x8xf32> -> vector<16x8xf32>
    %c0_91 = arith.constant 0 : index
    %c0_92 = arith.constant 0 : index
    %194 = vector.load %arg27[%c0_91, %c0_92] : memref<1x8xf32, #tpu.memory_space<vmem>>, vector<1x8xf32>
    %195 = vector.broadcast %194 : vector<1x8xf32> to vector<16x8xf32>
    %196 = arith.addf %193, %195 : vector<16x8xf32>
    %cst_93 = arith.constant 0.000000e+00 : f32
    %197 = vector.broadcast %cst_93 : f32 to vector<16x8xf32>
    %198 = arith.maximumf %196, %197 : vector<16x8xf32>
    %199 = arith.addf %198, %184 : vector<16x8xf32>
    %cst_94 = arith.constant dense<0.000000e+00> : vector<16xf32>
    %200 = vector.multi_reduction <add>, %199, %cst_94 [1] : vector<16x8xf32> to vector<16xf32>
    %201 = vector.shape_cast %200 : vector<16xf32> to vector<16x1xf32>
    %cst_95 = arith.constant 8.000000e+00 : f32
    %202 = vector.broadcast %cst_95 : f32 to vector<16x1xf32>
    %203 = arith.divf %201, %202 : vector<16x1xf32>
    %204 = vector.broadcast %203 : vector<16x1xf32> to vector<16x8xf32>
    %205 = arith.subf %199, %204 : vector<16x8xf32>
    %206 = arith.mulf %205, %205 : vector<16x8xf32>
    %cst_96 = arith.constant dense<0.000000e+00> : vector<16xf32>
    %207 = vector.multi_reduction <add>, %206, %cst_96 [1] : vector<16x8xf32> to vector<16xf32>
    %208 = vector.shape_cast %207 : vector<16xf32> to vector<16x1xf32>
    %cst_97 = arith.constant 8.000000e+00 : f32
    %209 = vector.broadcast %cst_97 : f32 to vector<16x1xf32>
    %210 = arith.divf %208, %209 : vector<16x1xf32>
    %211 = vector.broadcast %203 : vector<16x1xf32> to vector<16x8xf32>
    %212 = arith.subf %199, %211 : vector<16x8xf32>
    %cst_98 = arith.constant 9.99999974E-6 : f32
    %213 = vector.broadcast %cst_98 : f32 to vector<16x1xf32>
    %214 = arith.addf %210, %213 : vector<16x1xf32>
    %215 = math.rsqrt %214 : vector<16x1xf32>
    %216 = vector.broadcast %215 : vector<16x1xf32> to vector<16x8xf32>
    %217 = arith.mulf %212, %216 : vector<16x8xf32>
    %c0_99 = arith.constant 0 : index
    %c0_100 = arith.constant 0 : index
    %218 = vector.load %arg28[%c0_99, %c0_100] : memref<1x8xf32, #tpu.memory_space<vmem>>, vector<1x8xf32>
    %219 = vector.broadcast %218 : vector<1x8xf32> to vector<16x8xf32>
    %220 = arith.mulf %217, %219 : vector<16x8xf32>
    %c0_101 = arith.constant 0 : index
    %c0_102 = arith.constant 0 : index
    %221 = vector.load %arg29[%c0_101, %c0_102] : memref<1x8xf32, #tpu.memory_space<vmem>>, vector<1x8xf32>
    %222 = vector.broadcast %221 : vector<1x8xf32> to vector<16x8xf32>
    %223 = arith.addf %220, %222 : vector<16x8xf32>
    %c0_103 = arith.constant 0 : index
    %c0_104 = arith.constant 0 : index
    %224 = vector.load %arg32[%c0_103, %c0_104] : memref<16x8xf32, #tpu.memory_space<vmem>>, vector<16x8xf32>
    tpu.vector_store %arg32[%c0_103, %c0_104], %223 {strides = array<i32>} : memref<16x8xf32, #tpu.memory_space<vmem>>, vector<16x8xf32>,
    %c0_105 = arith.constant 0 : index
    %c0_106 = arith.constant 0 : index
    %225 = vector.load %arg30[%c0_105, %c0_106] : memref<8x16xf32, #tpu.memory_space<vmem>>, vector<8x16xf32>
    %cst_107 = arith.constant dense<0.000000e+00> : vector<16x16xf32>
    %226 = tpu.matmul %223, %225, %cst_107 {dimension_numbers = #tpu.dot_dimension_numbers<[1], [0], [0], [1], [0, 0, 1, 1], [], []>} : vector<16x8xf32>, vector<8x16xf32>, vector<16x16xf32> -> vector<16x16xf32>
    %c0_108 = arith.constant 0 : index
    %c0_109 = arith.constant 0 : index
    %227 = vector.load %arg31[%c0_108, %c0_109] : memref<1x16xf32, #tpu.memory_space<vmem>>, vector<1x16xf32>
    %228 = vector.broadcast %227 : vector<1x16xf32> to vector<16x16xf32>
    %229 = arith.addf %226, %228 : vector<16x16xf32>
    %c0_110 = arith.constant 0 : index
    %c0_111 = arith.constant 0 : index
    %230 = vector.load %arg33[%c0_110, %c0_111] : memref<16x16xf32, #tpu.memory_space<vmem>>, vector<16x16xf32>
    tpu.vector_store %arg33[%c0_110, %c0_111], %229 {strides = array<i32>} : memref<16x16xf32, #tpu.memory_space<vmem>>, vector<16x16xf32>,
    return
  }
  func.func @transform_0(%arg0: i32) -> (i32, i32, i32) {
    %c0_i32 = arith.constant 0 : i32
    %c0_i32_0 = arith.constant 0 : i32
    %c0_i32_1 = arith.constant 0 : i32
    %c0_i32_2 = arith.constant 0 : i32
    return %c0_i32, %c0_i32_0, %c0_i32_1 : i32, i32, i32
  }
  func.func @transform_1(%arg0: i32) -> (i32, i32) {
    %c0_i32 = arith.constant 0 : i32
    %c0_i32_0 = arith.constant 0 : i32
    %c0_i32_1 = arith.constant 0 : i32
    return %c0_i32, %c0_i32_0 : i32, i32
  }
  func.func @transform_2(%arg0: i32) -> (i32, i32) {
    %c0_i32 = arith.constant 0 : i32
    %c0_i32_0 = arith.constant 0 : i32
    %c0_i32_1 = arith.constant 0 : i32
    return %c0_i32, %c0_i32_0 : i32, i32
  }
  func.func @transform_3(%arg0: i32) -> (i32, i32) {
    %c0_i32 = arith.constant 0 : i32
    %c0_i32_0 = arith.constant 0 : i32
    %c0_i32_1 = arith.constant 0 : i32
    return %c0_i32, %c0_i32_0 : i32, i32
  }
  func.func @transform_4(%arg0: i32) -> (i32, i32) {
    %c0_i32 = arith.constant 0 : i32
    %c0_i32_0 = arith.constant 0 : i32
    %c0_i32_1 = arith.constant 0 : i32
    return %c0_i32, %c0_i32_0 : i32, i32
  }
  func.func @transform_5(%arg0: i32) -> (i32, i32) {
    %c0_i32 = arith.constant 0 : i32
    %c0_i32_0 = arith.constant 0 : i32
    %c0_i32_1 = arith.constant 0 : i32
    return %c0_i32, %c0_i32_0 : i32, i32
  }
  func.func @transform_6(%arg0: i32) -> (i32, i32) {
    %c0_i32 = arith.constant 0 : i32
    %c0_i32_0 = arith.constant 0 : i32
    %c0_i32_1 = arith.constant 0 : i32
    return %c0_i32, %c0_i32_0 : i32, i32
  }
  func.func @transform_7(%arg0: i32) -> (i32, i32) {
    %c0_i32 = arith.constant 0 : i32
    %c0_i32_0 = arith.constant 0 : i32
    %c0_i32_1 = arith.constant 0 : i32
    return %c0_i32, %c0_i32_0 : i32, i32
  }
  func.func @transform_8(%arg0: i32) -> (i32, i32) {
    %c0_i32 = arith.constant 0 : i32
    %c0_i32_0 = arith.constant 0 : i32
    %c0_i32_1 = arith.constant 0 : i32
    return %c0_i32, %c0_i32_0 : i32, i32
  }
  func.func @transform_9(%arg0: i32) -> (i32, i32) {
    %c0_i32 = arith.constant 0 : i32
    %c0_i32_0 = arith.constant 0 : i32
    %c0_i32_1 = arith.constant 0 : i32
    return %c0_i32, %c0_i32_0 : i32, i32
  }
  func.func @transform_10(%arg0: i32) -> (i32, i32) {
    %c0_i32 = arith.constant 0 : i32
    %c0_i32_0 = arith.constant 0 : i32
    %c0_i32_1 = arith.constant 0 : i32
    return %c0_i32, %c0_i32_0 : i32, i32
  }
  func.func @transform_11(%arg0: i32) -> (i32, i32) {
    %c0_i32 = arith.constant 0 : i32
    %c0_i32_0 = arith.constant 0 : i32
    %c0_i32_1 = arith.constant 0 : i32
    return %c0_i32, %c0_i32_0 : i32, i32
  }
  func.func @transform_12(%arg0: i32) -> (i32, i32) {
    %c0_i32 = arith.constant 0 : i32
    %c0_i32_0 = arith.constant 0 : i32
    %c0_i32_1 = arith.constant 0 : i32
    return %c0_i32, %c0_i32_0 : i32, i32
  }
  func.func @transform_13(%arg0: i32) -> (i32, i32) {
    %c0_i32 = arith.constant 0 : i32
    %c0_i32_0 = arith.constant 0 : i32
    %c0_i32_1 = arith.constant 0 : i32
    return %c0_i32, %c0_i32_0 : i32, i32
  }
  func.func @transform_14(%arg0: i32) -> (i32, i32) {
    %c0_i32 = arith.constant 0 : i32
    %c0_i32_0 = arith.constant 0 : i32
    %c0_i32_1 = arith.constant 0 : i32
    return %c0_i32, %c0_i32_0 : i32, i32
  }
  func.func @transform_15(%arg0: i32) -> (i32, i32) {
    %c0_i32 = arith.constant 0 : i32
    %c0_i32_0 = arith.constant 0 : i32
    %c0_i32_1 = arith.constant 0 : i32
    return %c0_i32, %c0_i32_0 : i32, i32
  }
  func.func @transform_16(%arg0: i32) -> (i32, i32) {
    %c0_i32 = arith.constant 0 : i32
    %c0_i32_0 = arith.constant 0 : i32
    %c0_i32_1 = arith.constant 0 : i32
    return %c0_i32, %c0_i32_0 : i32, i32
  }
  func.func @transform_17(%arg0: i32) -> (i32, i32) {
    %c0_i32 = arith.constant 0 : i32
    %c0_i32_0 = arith.constant 0 : i32
    %c0_i32_1 = arith.constant 0 : i32
    return %c0_i32, %c0_i32_0 : i32, i32
  }
  func.func @transform_18(%arg0: i32) -> (i32, i32) {
    %c0_i32 = arith.constant 0 : i32
    %c0_i32_0 = arith.constant 0 : i32
    %c0_i32_1 = arith.constant 0 : i32
    return %c0_i32, %c0_i32_0 : i32, i32
  }
  func.func @transform_19(%arg0: i32) -> (i32, i32) {
    %c0_i32 = arith.constant 0 : i32
    %c0_i32_0 = arith.constant 0 : i32
    %c0_i32_1 = arith.constant 0 : i32
    return %c0_i32, %c0_i32_0 : i32, i32
  }
  func.func @transform_20(%arg0: i32) -> (i32, i32) {
    %c0_i32 = arith.constant 0 : i32
    %c0_i32_0 = arith.constant 0 : i32
    %c0_i32_1 = arith.constant 0 : i32
    return %c0_i32, %c0_i32_0 : i32, i32
  }
  func.func @transform_21(%arg0: i32) -> (i32, i32) {
    %c0_i32 = arith.constant 0 : i32
    %c0_i32_0 = arith.constant 0 : i32
    %c0_i32_1 = arith.constant 0 : i32
    return %c0_i32, %c0_i32_0 : i32, i32
  }
  func.func @transform_22(%arg0: i32) -> (i32, i32) {
    %c0_i32 = arith.constant 0 : i32
    %c0_i32_0 = arith.constant 0 : i32
    %c0_i32_1 = arith.constant 0 : i32
    return %c0_i32, %c0_i32_0 : i32, i32
  }
  func.func @transform_23(%arg0: i32) -> (i32, i32) {
    %c0_i32 = arith.constant 0 : i32
    %c0_i32_0 = arith.constant 0 : i32
    %c0_i32_1 = arith.constant 0 : i32
    return %c0_i32, %c0_i32_0 : i32, i32
  }
  func.func @transform_24(%arg0: i32) -> (i32, i32) {
    %c0_i32 = arith.constant 0 : i32
    %c0_i32_0 = arith.constant 0 : i32
    %c0_i32_1 = arith.constant 0 : i32
    return %c0_i32, %c0_i32_0 : i32, i32
  }
  func.func @transform_25(%arg0: i32) -> (i32, i32) {
    %c0_i32 = arith.constant 0 : i32
    %c0_i32_0 = arith.constant 0 : i32
    %c0_i32_1 = arith.constant 0 : i32
    return %c0_i32, %c0_i32_0 : i32, i32
  }
  func.func @transform_26(%arg0: i32) -> (i32, i32) {
    %c0_i32 = arith.constant 0 : i32
    %c0_i32_0 = arith.constant 0 : i32
    %c0_i32_1 = arith.constant 0 : i32
    return %c0_i32, %c0_i32_0 : i32, i32
  }
  func.func @transform_27(%arg0: i32) -> (i32, i32) {
    %c0_i32 = arith.constant 0 : i32
    %c0_i32_0 = arith.constant 0 : i32
    %c0_i32_1 = arith.constant 0 : i32
    return %c0_i32, %c0_i32_0 : i32, i32
  }
  func.func @transform_28(%arg0: i32) -> (i32, i32) {
    %c0_i32 = arith.constant 0 : i32
    %c0_i32_0 = arith.constant 0 : i32
    %c0_i32_1 = arith.constant 0 : i32
    return %c0_i32, %c0_i32_0 : i32, i32
  }
  func.func @transform_29(%arg0: i32) -> (i32, i32) {
    %c0_i32 = arith.constant 0 : i32
    %c0_i32_0 = arith.constant 0 : i32
    %c0_i32_1 = arith.constant 0 : i32
    return %c0_i32, %c0_i32_0 : i32, i32
  }
  func.func @transform_30(%arg0: i32) -> (i32, i32) {
    %c0_i32 = arith.constant 0 : i32
    %c0_i32_0 = arith.constant 0 : i32
    %c0_i32_1 = arith.constant 0 : i32
    return %c0_i32, %c0_i32_0 : i32, i32
  }
  func.func @transform_31(%arg0: i32) -> (i32, i32) {
    %c0_i32 = arith.constant 0 : i32
    %c0_i32_0 = arith.constant 0 : i32
    %c0_i32_1 = arith.constant 0 : i32
    return %c0_i32, %c0_i32_0 : i32, i32
  }
  func.func @transform_32(%arg0: i32) -> (i32, i32) {
    %c0_i32 = arith.constant 0 : i32
    %c0_i32_0 = arith.constant 0 : i32
    %c0_i32_1 = arith.constant 0 : i32
    return %c0_i32, %c0_i32_0 : i32, i32
  }
}

</mosaic_0001>

<bundles_post_ra>
// kernel: t1_encoder_forward.1
= control target key start
LH: loop header
LB: loop body
LE: loop exit
PB: predicated region body
PF: predicated region fallthrough
CT: control target
= control target key end

     0   :  { %s1805_s6 = smov 1   ;;  %s1806_s10 = smov 2   ;;  %s2194_s0 = inlined_call_operand.smem [shape: u32[33], index: -1, kind: input, shape index: {}] }
   0x1   :  { %s1865_s5 = sld [smem:[%s2194_s0]]   ;;  %s1807_s14 = smov 3  }
   0x2   :  { %s1870_s9 = sld [smem:[%s2194_s0 + %s1805_s6]]   ;;  %s1808_s18 = smov 4  }
   0x3   :  { %s1875_s13 = sld [smem:[%s2194_s0 + %s1806_s10]]   ;;  %s1809_s22 = smov 5  }
   0x4   :  { %s1880_s17 = sld [smem:[%s2194_s0 + %s1807_s14]]   ;;  %s1810_s26 = smov 6  }
   0x5   :  { %s1885_s21 = sld [smem:[%s2194_s0 + %s1808_s18]]   ;;  %s1811_s30 = smov 7  }
   0x6   :  { %s1890_s25 = sld [smem:[%s2194_s0 + %s1809_s22]]   ;;  %s1812_s4 = smov 8  }
   0x7   :  { %s1895_s29 = sld [smem:[%s2194_s0 + %s1810_s26]]   ;;  %s1813_s10 = smov 9  }
   0x8   :  { %s1900_s3 = sld [smem:[%s2194_s0 + %s1811_s30]]   ;;  %s1814_s15 = smov 10  }
   0x9   :  { %2195 = sst [smem:[#allocation35_spill]] %s1875_s13  ;;  %s1815_s20 = smov 11  }
   0xa   :  { %2196 = sst [smem:[#allocation36_spill]] %s1880_s17  ;;  %s1816_s26 = smov 12  }
   0xb   :  { %2197 = sst [smem:[#allocation37_spill]] %s1885_s21  ;;  %s1817_s1 = smov 13  }
   0xc   :  { %2198 = sst [smem:[#allocation38_spill]] %s1890_s25  ;;  %s1818_s7 = smov 14  }
   0xd   :  { %2199 = sst [smem:[#allocation39_spill]] %s1895_s29  ;;  %s1820_s22 = smov 16  }
   0xe   :  { %s1905_s8 = sld [smem:[%s2194_s0 + %s1812_s4]]   ;;  %s1821_s28 = smov 17  }
   0xf   :  { %s1910_s14 = sld [smem:[%s2194_s0 + %s1813_s10]]  }
  0x10   :  { %s1915_s19 = sld [smem:[%s2194_s0 + %s1814_s15]]   ;;  %s1819_s15 = smov 15  }
  0x11   :  { %s1920_s24 = sld [smem:[%s2194_s0 + %s1815_s20]]  }
  0x12   :  { %s1925_s30 = sld [smem:[%s2194_s0 + %s1816_s26]]  }
  0x13   :  { %s1930_s6 = sld [smem:[%s2194_s0 + %s1817_s1]]  }
  0x14   :  { %s1935_s12 = sld [smem:[%s2194_s0 + %s1818_s7]]   ;;  %s1822_s7 = smov 18  }
  0x15   :  { %2200 = sst [smem:[#allocation40_spill]] %s1910_s14 }
  0x16   :  { %s1940_s20 = sld [smem:[%s2194_s0 + %s1819_s15]]   ;;  %s1823_s15 = smov 19  }
  0x17   :  { %2201 = sst [smem:[#allocation41_spill]] %s1920_s24 }
  0x18   :  { %s1945_s27 = sld [smem:[%s2194_s0 + %s1820_s22]]   ;;  %s1824_s22 = smov 20  }
  0x19   :  { %s1950_s4 = sld [smem:[%s2194_s0 + %s1821_s28]]   ;;  %s1825_s28 = smov 21  }
  0x1a   :  { %s1955_s24 = sld [smem:[%s2194_s0 + %s1822_s7]]   ;;  %s1826_s7 = smov 22  }
  0x1c   :  { %2202 = sst [smem:[#allocation42_spill]] %s1940_s20 }
  0x1d   :  { %s1960_s20 = sld [smem:[%s2194_s0 + %s1823_s15]]   ;;  %s1827_s15 = smov 23  }
  0x1e   :  { %2203 = sst [smem:[#allocation43_spill]] %s1945_s27 }
  0x1f   :  { %2204 = sst [smem:[#allocation44_spill]] %s1950_s4 }
  0x20   :  { %2205 = sst [smem:[#allocation45_spill]] %s1955_s24 }
  0x21   :  { %s1965_s27 = sld [smem:[%s2194_s0 + %s1824_s22]]   ;;  %s1828_s22 = smov 24  }
  0x22   :  { %s1970_s4 = sld [smem:[%s2194_s0 + %s1825_s28]]   ;;  %s1829_s28 = smov 25  }
  0x23   :  { %2206 = sst [smem:[#allocation46_spill]] %s1960_s20 }
  0x24   :  { %s1975_s24 = sld [smem:[%s2194_s0 + %s1826_s7]]   ;;  %s1830_s7 = smov 26  }
  0x25   :  { %s1980_s20 = sld [smem:[%s2194_s0 + %s1827_s15]]   ;;  %s1831_s15 = smov 27  }
  0x26   :  { %s1990_s14 = sld [smem:[%s2194_s0 + %s1829_s28]]   ;;  %s1833_s28 = smov 29  }
  0x27   :  { %2207 = sst [smem:[#allocation47_spill]] %s1965_s27 }
  0x28   :  { %s1985_s27 = sld [smem:[%s2194_s0 + %s1828_s22]]   ;;  %s1832_s22 = smov 28  }
  0x29   :  { %s1995_s29 = sld [smem:[%s2194_s0 + %s1830_s7]]   ;;  %s1834_s7 = smov 30  }
  0x2a   :  { %s2005_s21 = sld [smem:[%s2194_s0 + %s1832_s22]]   ;;  %s1836_s22 = smov 32  }
  0x2b   :  { %2208 = sst [smem:[#allocation48_spill]] %s1980_s20 }
  0x2c   :  { %2209 = sst [smem:[#allocation49_spill]] %s1990_s14 }
  0x2d   :  { %s2000_s20 = sld [smem:[%s2194_s0 + %s1831_s15]]   ;;  %s1835_s15 = smov 31  }
  0x2e   :  { %s2010_s14 = sld [smem:[%s2194_s0 + %s1833_s28]]  }
  0x2f   :  { %s2015_s25 = sld [smem:[%s2194_s0 + %s1834_s7]]  }
  0x30   :  { %s2020_s17 = sld [smem:[%s2194_s0 + %s1835_s15]]  }
  0x31   :  { %s2025_s13 = sld [smem:[%s2194_s0 + %s1836_s22]]  }
  0x32   :  { %71 = vsyncpa [#allocation3], 0 }
  0x33   :  { %72 = vsyncpa [#allocation6], 0 }
  0x34   :  { %73 = vsyncpa [#allocation9], 0 }
  0x35   :  { %74 = vsyncpa [#allocation12], 0 }
  0x36   :  { %75 = vsyncpa [#allocation15], 0 }
  0x37   :  { %76 = vsyncpa [#allocation18], 0 }
  0x38   :  { %77 = vsyncpa [#allocation21], 0 }
  0x39   :  { %78 = vsyncpa [#allocation4], 0  ;;  %s110_s28 = sshll.u32 %s1905_s8, 4  ;;  %s111_s28 = int_to_ptr.hbm [resolvable:$true] %s110_s28 }
  0x3a   :  { %79 = vsyncpa [#allocation25], 0  ;;  %s1837_s1 = smov [#allocation5]   ;;  %s136_s0 = sshll.u32 %s1925_s30, 4  ;;  %s137_s0 = int_to_ptr.hbm [resolvable:$true] %s136_s0 }
  0x3b   :  { %s112_s2 = sshll.u32 %s1837_s1, 4  ;;  %s1427_s7 = sshra.s32 %s111_s28, 4  ;;  %s113_s2 = int_to_ptr.vmem [resolvable:$true] %s112_s2  ;;  %s1428_s7 = int_to_ptr.hbm [resolvable:$true] %s1427_s7 }
  0x3c   :  { %s1429_s10 = scalar_lea.hbm %s1428_s7, 1  ;;  %s1431_s11 = scalar_lea.hbm %s1905_s8, 1 }
  0x3d   :  { %p1430_p0 = scmp.ne.s32.totalorder %s1428_s7, %s1429_s10  ;;  %p1432_p1 = scmp.lt.s32.totalorder %s1428_s7, %s1905_s8 }
  0x3e   :  { %p1433_p2 = scmp.lt.s32.totalorder %s1431_s11, %s1429_s10 }
  0x40   :  { %p1434_p3 = por %p1433_p2, %p1432_p1 }
  0x42   :  { %p1435_p4 = pnand %p1434_p3, %p1430_p0 }
  0x44   :  { %1438 = shalt.err (!%p1435_p4)
}
  0x45   :  { %115 = dma.hbm_to_vmem [thread:$0]  %s111_s28, 16, %s113_s2, [#allocation6]  }
  0x46   :  { %s1838_s15 = smov [#allocation8]   ;;  %s158_s18 = sshll.u32 %s1935_s12, 4  ;;  %s159_s18 = int_to_ptr.hbm [resolvable:$true] %s158_s18 }
  0x47   :  { %s138_s16 = sshll.u32 %s1838_s15, 4  ;;  %s1451_s22 = sshra.s32 %s137_s0, 4  ;;  %s139_s16 = int_to_ptr.vmem [resolvable:$true] %s138_s16  ;;  %s1452_s22 = int_to_ptr.hbm [resolvable:$true] %s1451_s22 }
  0x48   :  { %s1453_s23 = scalar_lea.hbm %s1452_s22, 1  ;;  %s1455_s26 = scalar_lea.hbm %s1925_s30, 1 }
  0x49   :  { %p1454_p5 = scmp.ne.s32.totalorder %s1452_s22, %s1453_s23  ;;  %p1456_p6 = scmp.lt.s32.totalorder %s1452_s22, %s1925_s30 }
  0x4a   :  { %p1457_p7 = scmp.lt.s32.totalorder %s1455_s26, %s1453_s23 }
  0x4c   :  { %p1458_p8 = por %p1457_p7, %p1456_p6 }
  0x4e   :  { %p1459_p9 = pnand %p1458_p8, %p1454_p5 }
  0x50   :  { %1462 = shalt.err (!%p1459_p9)
}
  0x51   :  { %141 = dma.hbm_to_vmem [thread:$0]  %s137_s0, 16, %s139_s16, [#allocation9]  }
  0x52   :  { %s192_s8 = sshll.u32 %s1975_s24, 4  ;;  %s1839_s28 = smov [#allocation11]   ;;  %s193_s8 = int_to_ptr.hbm [resolvable:$true] %s192_s8 }
  0x53   :  { %s160_s1 = sshll.u32 %s1839_s28, 4  ;;  %s1475_s2 = sshra.s32 %s159_s18, 4  ;;  %s161_s1 = int_to_ptr.vmem [resolvable:$true] %s160_s1  ;;  %s1476_s2 = int_to_ptr.hbm [resolvable:$true] %s1475_s2 }
  0x54   :  { %s1477_s7 = scalar_lea.hbm %s1476_s2, 1  ;;  %s1479_s10 = scalar_lea.hbm %s1935_s12, 1 }
  0x55   :  { %p1478_p10 = scmp.ne.s32.totalorder %s1476_s2, %s1477_s7  ;;  %p1480_p11 = scmp.lt.s32.totalorder %s1476_s2, %s1935_s12 }
  0x56   :  { %p1481_p12 = scmp.lt.s32.totalorder %s1479_s10, %s1477_s7 }
  0x58   :  { %p1482_p13 = por %p1481_p12, %p1480_p11 }
  0x5a   :  { %p1483_p0 = pnand %p1482_p13, %p1478_p10 }
  0x5c   :  { %1486 = shalt.err (!%p1483_p0)
}
  0x5d   :  { %163 = dma.hbm_to_vmem [thread:$0]  %s159_s18, 16, %s161_s1, [#allocation12]  }
  0x5e   :  { %s1840_s30 = smov [#allocation14]   ;;  %s218_s11 = sshll.u32 %s1995_s29, 4  ;;  %s219_s11 = int_to_ptr.hbm [resolvable:$true] %s218_s11 }
  0x5f   :  { %s194_s0 = sshll.u32 %s1840_s30, 4  ;;  %s1499_s15 = sshra.s32 %s193_s8, 4  ;;  %s195_s0 = int_to_ptr.vmem [resolvable:$true] %s194_s0  ;;  %s1500_s15 = int_to_ptr.hbm [resolvable:$true] %s1499_s15 }
  0x60   :  { %s1501_s16 = scalar_lea.hbm %s1500_s15, 1  ;;  %s1503_s22 = scalar_lea.hbm %s1975_s24, 1 }
  0x61   :  { %p1502_p1 = scmp.ne.s32.totalorder %s1500_s15, %s1501_s16  ;;  %p1504_p2 = scmp.lt.s32.totalorder %s1500_s15, %s1975_s24 }
  0x62   :  { %p1505_p3 = scmp.lt.s32.totalorder %s1503_s22, %s1501_s16 }
  0x64   :  { %p1506_p4 = por %p1505_p3, %p1504_p2 }
  0x66   :  { %p1507_p5 = pnand %p1506_p4, %p1502_p1 }
  0x68   :  { %1510 = shalt.err (!%p1507_p5)
}
  0x69   :  { %197 = dma.hbm_to_vmem [thread:$0]  %s193_s8, 16, %s195_s0, [#allocation15]  }
  0x6a   :  { %s240_s12 = sshll.u32 %s2005_s21, 4  ;;  %s1841_s18 = smov [#allocation17]   ;;  %s241_s12 = int_to_ptr.hbm [resolvable:$true] %s240_s12 }
  0x6b   :  { %s220_s23 = sshll.u32 %s1841_s18, 4  ;;  %s1523_s26 = sshra.s32 %s219_s11, 4  ;;  %s221_s23 = int_to_ptr.vmem [resolvable:$true] %s220_s23  ;;  %s1524_s26 = int_to_ptr.hbm [resolvable:$true] %s1523_s26 }
  0x6c   :  { %s1525_s28 = scalar_lea.hbm %s1524_s26, 1  ;;  %s1527_s1 = scalar_lea.hbm %s1995_s29, 1 }
  0x6d   :  { %p1526_p6 = scmp.ne.s32.totalorder %s1524_s26, %s1525_s28  ;;  %p1528_p7 = scmp.lt.s32.totalorder %s1524_s26, %s1995_s29 }
  0x6e   :  { %p1529_p8 = scmp.lt.s32.totalorder %s1527_s1, %s1525_s28 }
  0x70   :  { %p1530_p9 = por %p1529_p8, %p1528_p7 }
  0x72   :  { %p1531_p10 = pnand %p1530_p9, %p1526_p6 }
  0x74   :  { %1534 = shalt.err (!%p1531_p10)
}
  0x75   :  { %223 = dma.hbm_to_vmem [thread:$0]  %s219_s11, 16, %s221_s23, [#allocation18]  }
  0x76   :  { %s1842_s24 = smov [#allocation20]   ;;  %s99_s2 = sshll.u32 %s1900_s3, 4  ;;  %s100_s2 = int_to_ptr.hbm [resolvable:$true] %s99_s2 }
  0x77   :  { %s242_s8 = sshll.u32 %s1842_s24, 4  ;;  %s1547_s7 = sshra.s32 %s241_s12, 4  ;;  %s243_s8 = int_to_ptr.vmem [resolvable:$true] %s242_s8  ;;  %s1548_s7 = int_to_ptr.hbm [resolvable:$true] %s1547_s7 }
  0x78   :  { %s1549_s10 = scalar_lea.hbm %s1548_s7, 1  ;;  %s1551_s30 = scalar_lea.hbm %s2005_s21, 1 }
  0x79   :  { %p1550_p11 = scmp.ne.s32.totalorder %s1548_s7, %s1549_s10  ;;  %p1552_p12 = scmp.lt.s32.totalorder %s1548_s7, %s2005_s21 }
  0x7a   :  { %p1553_p13 = scmp.lt.s32.totalorder %s1551_s30, %s1549_s10 }
  0x7c   :  { %p1554_p0 = por %p1553_p13, %p1552_p12 }
  0x7e   :  { %p1555_p1 = pnand %p1554_p0, %p1550_p11 }
  0x80   :  { %1558 = shalt.err (!%p1555_p1)
}
  0x81   :  { %245 = dma.hbm_to_vmem [thread:$0]  %s241_s12, 16, %s243_s8, [#allocation21]  }
  0x82   :  { %s123_s29 = sshll.u32 %s1915_s19, 4  ;;  %s1843_s0 = smov [#allocation2]   ;;  %s124_s29 = int_to_ptr.hbm [resolvable:$true] %s123_s29 }
  0x83   :  { %s101_s11 = sshll.u32 %s1843_s0, 4  ;;  %s1571_s15 = sshra.s32 %s100_s2, 4  ;;  %s102_s11 = int_to_ptr.vmem [resolvable:$true] %s101_s11  ;;  %s1572_s15 = int_to_ptr.hbm [resolvable:$true] %s1571_s15 }
  0x84   :  { %s1573_s16 = scalar_lea.hbm %s1572_s15, 1  ;;  %s1575_s22 = scalar_lea.hbm %s1900_s3, 1 }
  0x85   :  { %p1574_p2 = scmp.ne.s32.totalorder %s1572_s15, %s1573_s16  ;;  %p1576_p3 = scmp.lt.s32.totalorder %s1572_s15, %s1900_s3 }
  0x86   :  { %p1577_p4 = scmp.lt.s32.totalorder %s1575_s22, %s1573_s16 }
  0x88   :  { %p1578_p5 = por %p1577_p4, %p1576_p3 }
  0x8a   :  { %p1579_p6 = pnand %p1578_p5, %p1574_p2 }
  0x8c   :  { %1582 = shalt.err (!%p1579_p6)
}
  0x8d   :  { %104 = dma.hbm_to_vmem [thread:$0]  %s100_s2, 16, %s102_s11, [#allocation3]  }
  0x8e   :  { %s1844_s21 = smov [#allocation7]   ;;  %s147_s18 = sshll.u32 %s1930_s6, 4  ;;  %s148_s18 = int_to_ptr.hbm [resolvable:$true] %s147_s18 }
  0x8f   :  { %s125_s12 = sshll.u32 %s1844_s21, 4  ;;  %s1595_s23 = sshra.s32 %s124_s29, 4  ;;  %s126_s12 = int_to_ptr.vmem [resolvable:$true] %s125_s12  ;;  %s1596_s23 = int_to_ptr.hbm [resolvable:$true] %s1595_s23 }
  0x90   :  { %s1597_s26 = scalar_lea.hbm %s1596_s23, 1  ;;  %s1599_s28 = scalar_lea.hbm %s1915_s19, 1 }
  0x91   :  { %p1598_p7 = scmp.ne.s32.totalorder %s1596_s23, %s1597_s26  ;;  %p1600_p8 = scmp.lt.s32.totalorder %s1596_s23, %s1915_s19 }
  0x92   :  { %p1601_p9 = scmp.lt.s32.totalorder %s1599_s28, %s1597_s26 }
  0x94   :  { %p1602_p10 = por %p1601_p9, %p1600_p8 }
  0x96   :  { %p1603_p11 = pnand %p1602_p10, %p1598_p7 }
  0x98   :  { %1606 = shalt.err (!%p1603_p11)
}
  0x99   :  { %128 = dma.hbm_to_vmem [thread:$0]  %s124_s29, 16, %s126_s12, [#allocation6]  }
  0x9a   :  { %s181_s3 = sshll.u32 %s1970_s4, 4  ;;  %s1845_s1 = smov [#allocation10]   ;;  %s182_s3 = int_to_ptr.hbm [resolvable:$true] %s181_s3 }
  0x9b   :  { %s149_s24 = sshll.u32 %s1845_s1, 4  ;;  %s1619_s8 = sshra.s32 %s148_s18, 4  ;;  %s150_s24 = int_to_ptr.vmem [resolvable:$true] %s149_s24  ;;  %s1620_s8 = int_to_ptr.hbm [resolvable:$true] %s1619_s8 }
  0x9c   :  { %s1621_s2 = scalar_lea.hbm %s1620_s8, 1  ;;  %s1623_s7 = scalar_lea.hbm %s1930_s6, 1 }
  0x9d   :  { %p1622_p12 = scmp.ne.s32.totalorder %s1620_s8, %s1621_s2  ;;  %p1624_p13 = scmp.lt.s32.totalorder %s1620_s8, %s1930_s6 }
  0x9e   :  { %p1625_p0 = scmp.lt.s32.totalorder %s1623_s7, %s1621_s2 }
  0xa0   :  { %p1626_p1 = por %p1625_p0, %p1624_p13 }
  0xa2   :  { %p1627_p2 = pnand %p1626_p1, %p1622_p12 }
  0xa4   :  { %1630 = shalt.err (!%p1627_p2)
}
  0xa5   :  { %152 = dma.hbm_to_vmem [thread:$0]  %s148_s18, 16, %s150_s24, [#allocation9]  }
  0xa6   :  { %s1846_s19 = smov [#allocation13]   ;;  %s205_s30 = sshll.u32 %s1985_s27, 4  ;;  %s206_s30 = int_to_ptr.hbm [resolvable:$true] %s205_s30 }
  0xa7   :  { %s183_s10 = sshll.u32 %s1846_s19, 4  ;;  %s1643_s29 = sshra.s32 %s182_s3, 4  ;;  %s184_s10 = int_to_ptr.vmem [resolvable:$true] %s183_s10  ;;  %s1644_s29 = int_to_ptr.hbm [resolvable:$true] %s1643_s29 }
  0xa8   :  { %s1645_s0 = scalar_lea.hbm %s1644_s29, 1  ;;  %s1647_s11 = scalar_lea.hbm %s1970_s4, 1 }
  0xa9   :  { %p1646_p3 = scmp.ne.s32.totalorder %s1644_s29, %s1645_s0  ;;  %p1648_p4 = scmp.lt.s32.totalorder %s1644_s29, %s1970_s4 }
  0xaa   :  { %p1649_p5 = scmp.lt.s32.totalorder %s1647_s11, %s1645_s0 }
  0xac   :  { %p1650_p6 = por %p1649_p5, %p1648_p4 }
  0xae   :  { %p1651_p7 = pnand %p1650_p6, %p1646_p3 }
  0xb0   :  { %1654 = shalt.err (!%p1651_p7)
}
  0xb1   :  { %186 = dma.hbm_to_vmem [thread:$0]  %s182_s3, 16, %s184_s10, [#allocation12]  }
  0xb2   :  { %s229_s6 = sshll.u32 %s2000_s20, 4  ;;  %s1847_s15 = smov [#allocation16]   ;;  %s230_s6 = int_to_ptr.hbm [resolvable:$true] %s229_s6 }
  0xb3   :  { %s207_s16 = sshll.u32 %s1847_s15, 4  ;;  %s1667_s22 = sshra.s32 %s206_s30, 4  ;;  %s208_s16 = int_to_ptr.vmem [resolvable:$true] %s207_s16  ;;  %s1668_s22 = int_to_ptr.hbm [resolvable:$true] %s1667_s22 }
  0xb4   :  { %s1669_s21 = scalar_lea.hbm %s1668_s22, 1  ;;  %s1671_s12 = scalar_lea.hbm %s1985_s27, 1 }
  0xb5   :  { %p1670_p8 = scmp.ne.s32.totalorder %s1668_s22, %s1669_s21  ;;  %p1672_p9 = scmp.lt.s32.totalorder %s1668_s22, %s1985_s27 }
  0xb6   :  { %p1673_p10 = scmp.lt.s32.totalorder %s1671_s12, %s1669_s21 }
  0xb8   :  { %p1674_p11 = por %p1673_p10, %p1672_p9 }
  0xba   :  { %p1675_p12 = pnand %p1674_p11, %p1670_p8 }
  0xbc   :  { %1678 = shalt.err (!%p1675_p12)
}
  0xbd   :  { %210 = dma.hbm_to_vmem [thread:$0]  %s206_s30, 16, %s208_s16, [#allocation15]  }
  0xbe   :  { %s1848_s4 = smov [#allocation19]   ;;  %s253_s23 = sshll.u32 %s2015_s25, 4  ;;  %s254_s23 = int_to_ptr.hbm [resolvable:$true] %s253_s23 }
  0xbf   :  { %s231_s18 = sshll.u32 %s1848_s4, 4  ;;  %s1691_s26 = sshra.s32 %s230_s6, 4  ;;  %s232_s18 = int_to_ptr.vmem [resolvable:$true] %s231_s18  ;;  %s1692_s26 = int_to_ptr.hbm [resolvable:$true] %s1691_s26 }
  0xc0   :  { %s1693_s28 = scalar_lea.hbm %s1692_s26, 1  ;;  %s1695_s3 = scalar_lea.hbm %s2000_s20, 1 }
  0xc1   :  { %p1694_p13 = scmp.ne.s32.totalorder %s1692_s26, %s1693_s28  ;;  %p1696_p0 = scmp.lt.s32.totalorder %s1692_s26, %s2000_s20 }
  0xc2   :  { %p1697_p1 = scmp.lt.s32.totalorder %s1695_s3, %s1693_s28 }
  0xc4   :  { %p1698_p2 = por %p1697_p1, %p1696_p0 }
  0xc6   :  { %p1699_p3 = pnand %p1698_p2, %p1694_p13 }
  0xc8   :  { %1702 = shalt.err (!%p1699_p3)
}
  0xc9   :  { %234 = dma.hbm_to_vmem [thread:$0]  %s230_s6, 16, %s232_s18, [#allocation18]  }
  0xca   :  { %s1849_s27 = smov [#allocation22]   ;;  %s1715_s24 = sshra.s32 %s254_s23, 4  ;;  %s1716_s24 = int_to_ptr.hbm [resolvable:$true] %s1715_s24 }
  0xcb   :  { %s255_s1 = sshll.u32 %s1849_s27, 4  ;;  %s1717_s8 = scalar_lea.hbm %s1716_s24, 1  ;;  %s256_s1 = int_to_ptr.vmem [resolvable:$true] %s255_s1 }
  0xcc   :  { %p1718_p4 = scmp.ne.s32.totalorder %s1716_s24, %s1717_s8  ;;  %s1719_s2 = scalar_lea.hbm %s2015_s25, 1 }
  0xcd   :  { %p1720_p5 = scmp.lt.s32.totalorder %s1716_s24, %s2015_s25  ;;  %p1721_p6 = scmp.lt.s32.totalorder %s1719_s2, %s1717_s8 }
  0xcf   :  { %p1722_p7 = por %p1721_p6, %p1720_p5 }
  0xd1   :  { %p1723_p8 = pnand %p1722_p7, %p1718_p4 }
  0xd3   :  { %1726 = shalt.err (!%p1723_p8)
}
  0xd4   :  { %258 = dma.hbm_to_vmem [thread:$0]  %s254_s23, 16, %s256_s1, [#allocation21]  }
  0xd5   :  { %1787 = dma.done.wait [#allocation3], 16  }
  0xd6   :  { %1788 = vsyncadd [#allocation3], 4294967280 }
  0xd7   :  { %1789 = dma.done.wait [#allocation6], 32  }
  0xd8   :  { %1790 = vsyncadd [#allocation6], 4294967264 }
  0xd9   :  { %1791 = dma.done.wait [#allocation9], 32  }
  0xda   :  { %1792 = vsyncadd [#allocation9], 4294967264 }
  0xdb   :  { %1793 = dma.done.wait [#allocation12], 32  }
  0xdc   :  { %1794 = vsyncadd [#allocation12], 4294967264 }
  0xdd   :  { %1795 = dma.done.wait [#allocation15], 32  }
  0xde   :  { %1796 = vsyncadd [#allocation15], 4294967264 }
  0xdf   :  { %1797 = dma.done.wait [#allocation18], 32  }
  0xe0   :  { %1798 = vsyncadd [#allocation18], 4294967264 }
  0xe1   :  { %1799 = dma.done.wait [#allocation21], 32  }
  0xe2   :  { %1800 = vsyncadd [#allocation21], 4294967264  ;;  %s2210_s25 = sld [smem:[#allocation35_spill]]  ;;  %vm318_vm0 = vcmask 64512   ;;  %v313_v0 = vld [vmem:[%s1870_s9] sm:$0xff]  ;;  %v2073_v2 = vld [vmem:[%s1865_s5 + $0x8] sm:$0xff] }
  0xe3   :  { %s2211_s20 = sld [smem:[#allocation36_spill]]  ;;  %v2068_v1 = vld [vmem:[%s1865_s5] sm:$0xff]  ;;  %340 = vmatpush.msra.mxu0 %v313_v0  ;;  %s1850_s7 = smov 120   ;;  %vm655_vm8 = vcmask 1043456   ;;  %vm648_vm9 = vcmask 31744  }
  0xe4   :  { %1275 = vmatmul.msk.f32.vlgmr.msra.gmra.mxu0 %vm318_vm0, %v2068_v1  ;;  %s1851_s5 = smov 112   ;;  %s2212_s9 = sld [smem:[#allocation38_spill]] }
  0xe5   :  { %s2213_s19 = sld [smem:[#allocation37_spill]]  ;;  %s1206_s18 = sshll.u32 %s2020_s17, 4  ;;  %s1207_s18 = int_to_ptr.hbm [resolvable:$true] %s1206_s18 }
  0xe6   :  { %s2214_s10 = sld [smem:[#allocation39_spill]]  ;;  %s1751_s23 = sshra.s32 %s1207_s18, 4  ;;  %s1752_s23 = int_to_ptr.hbm [resolvable:$true] %s1751_s23 }
  0xe7   :  { %s2215_s30 = sld [smem:[#allocation40_spill]]  ;;  %s1753_s26 = scalar_lea.hbm %s1752_s23, 16 }
  0xe8   :  { %v1364_v3 = vld [vmem:[%s2210_s25] ss:$0 sm:$0xff]  ;;  %s2216_s29 = sld [smem:[#allocation41_spill]]  ;;  %p1754_p9 = scmp.ne.s32.totalorder %s1752_s23, %s1753_s26 }
  0xe9   :  { %v1365_v4 = vld [vmem:[%s2211_s20] ss:$0 sm:$0xff]  ;;  %s2217_s0 = sld [smem:[#allocation42_spill]]  ;;  %s1755_s28 = scalar_lea.hbm %s2020_s17, 16 }
  0xea   :  { %v508_v41 = vld [vmem:[%s2212_s9] sm:$0xff]  ;;  %s2218_s11 = sld [smem:[#allocation43_spill]]  ;;  %p1756_p10 = scmp.lt.s32.totalorder %s1752_s23, %s2020_s17 }
  0xeb   :  { %v1366_v47 = vld [vmem:[%s2213_s19] ss:$0 sm:$0xff]  ;;  %s2219_s6 = sld [smem:[#allocation44_spill]]  ;;  %p1757_p11 = scmp.lt.s32.totalorder %s1755_s28, %s1753_s26 }
  0xec   :  { %1276 = vmatmul.msk.f32.gmra.mxu0 %vm318_vm0, %v2073_v2  ;;  %v1367_v61 = vld [vmem:[%s2214_s10] ss:$0 sm:$0xff]  ;;  %s2220_s15 = sld [smem:[#allocation46_spill]] }
  0xed   :  { %s2221_s16 = sld [smem:[#allocation45_spill]]  ;;  %p1758_p12 = por %p1757_p11, %p1756_p10 }
  0xee   :  { %s2222_s22 = sld [smem:[#allocation47_spill]] }
  0xef   :  { %s2223_s21 = sld [smem:[#allocation48_spill]]  ;;  %p1759_p13 = pnand %p1758_p12, %p1754_p9 }
  0xf0   :  { %s2224_s12 = sld [smem:[#allocation49_spill]] }
 0x161   :  { %v342_v5 = vpop.f32.mrf.mxu0 }
 0x162   :  { %v343_v6 = vadd.f32 %v1364_v3, %v342_v5 }
 0x164   :  { %349 = vrot.lane.b32.xlu0 %v343_v6, %s1850_s7  ;;  %v408_v7 = vmul.f32 %v1365_v4, %v343_v6 }
 0x166   :  { %v410_v8 = vsel %vm318_vm0, %v408_v7, 0.0 }
 0x167   :  { %411 = vadd.xlane.f32.xlu1 %v410_v8  ;;  %v1852_v8 = vmov 8.0  }
 0x169   :  { %v345_v9 = vpop.f32.mrf.mxu0 }
 0x16a   :  { %v346_v10 = vadd.f32 %v1364_v3, %v345_v9 }
 0x16c   :  { %376 = vrot.lane.b32.xlu0 %v346_v10, %s1850_s7  ;;  %v409_v11 = vmul.f32 %v1365_v4, %v346_v10 }
 0x16e   :  { %v413_v12 = vsel %vm318_vm0, %v409_v11, 0.0 }
 0x16f   :  { %414 = vadd.xlane.f32.xlu2 %v413_v12 }
 0x174   :  { %452 = vrot.lane.b32.xlu0 %v343_v6, %s1851_s5 }
 0x1d6   :  { %v350_v13 = vpop.permute.xlu0 %349 }
 0x1d7   :  { %1277 = vmatpush.xpose.msk.msra.mxu1 %vm318_vm0, %v350_v13 }
 0x1da   :  { %1278 = vmatmul.msk.f32.vlgmr.msra.gmra.mxu1 %vm318_vm0, %v343_v6  ;;  %v412_v22 = vpop.xlane.xlu1 %411 }
 0x1db   :  { %v416_v23 = vmul.f32 0.35355338, %v412_v22  ;;  %534 = vmatpush.msrb.mxu1 %v508_v41 }
 0x1de   :  { %v377_v14 = vpop.permute.xlu0 %376 }
 0x1df   :  { %1279 = vmatpush.xpose.msk.msra.mxu2 %vm318_vm0, %v377_v14 }
 0x1e2   :  { %1280 = vmatmul.msk.f32.vlgmr.msra.gmra.mxu2 %vm318_vm0, %v346_v10  ;;  %v415_v29 = vpop.xlane.xlu2 %414 }
 0x1e3   :  { %v417_v31 = vmul.f32 0.35355338, %v415_v29 }
 0x1e6   :  { %v453_v15 = vpop.permute.xlu0 %452 }
 0x1e7   :  { %473 = vmatpush.msra.mxu3 %v453_v15 }
 0x257   :  { %v372_v16 = vpop.f32.mrf.mxu1 }
 0x258   :  { %v402_v17 = vmul.f32 0.35355338, %v372_v16 }
 0x25a   :  { %v418_v18 = vsel %vm318_vm0, %v402_v17, -inf }
 0x25b   :  { %419 = vmax.xlane.f32.xlu1 %v418_v18 }
 0x265   :  { %v399_v19 = vpop.f32.mrf.mxu2 }
 0x266   :  { %v403_v20 = vmul.f32 0.35355338, %v399_v19 }
 0x268   :  { %v421_v21 = vsel %vm318_vm0, %v403_v20, -inf }
 0x269   :  { %422 = vmax.xlane.f32.xlu2 %v421_v21 }
 0x274   :  { %478 = vrot.lane.b32.xlu1 %v346_v10, %s1851_s5 }
 0x2ce   :  { %v420_v24 = vpop.xlane.xlu1 %419 }
 0x2cf   :  { %v424_v25 = vmax.f32 %v420_v24, %v416_v23 }
 0x2d1   :  { %v426_v26 = vsub.f32 %v402_v17, %v424_v25  ;;  %v432_v27 = vsub.f32 %v416_v23, %v424_v25  ;;  %v607_v23 = vld [vmem:[%s2215_s30] sm:$0xff] }
 0x2d2   :  { %633 = vmatpush.msrb.mxu2 %v607_v23 }
 0x2d3   :  { %v428_v28 = vmul.f32 1.442695, %v426_v26  ;;  %v434_v42 = vmul.f32 1.442695, %v432_v27 }
 0x2d5   :  { %1385 = vpow2.f32 %v428_v28 }
 0x2db   :  { %v1386_v30 = vpop.eup %1385 }
 0x2dc   :  { %v423_v32 = vpop.xlane.xlu2 %422  ;;  %1281 = vmatmul.msk.f32.vlgmr.msra.gmra.mxu3 %vm318_vm0, %v1386_v30  ;;  %v438_v33 = vsel %vm318_vm0, %v1386_v30, 0.0 }
 0x2dd   :  { %v425_v34 = vmax.f32 %v423_v32, %v417_v31  ;;  %439 = vadd.xlane.f32.xlu2 %v438_v33 }
 0x2df   :  { %v427_v35 = vsub.f32 %v403_v20, %v425_v34  ;;  %v433_v36 = vsub.f32 %v417_v31, %v425_v34 }
 0x2e1   :  { %v430_v37 = vmul.f32 1.442695, %v427_v35  ;;  %v436_v46 = vmul.f32 1.442695, %v433_v36  ;;  %v1368_v36 = vld [vmem:[#allocation2] ss:$0 sm:$0xff] }
 0x2e3   :  { %1387 = vpow2.f32 %v430_v37 }
 0x2e4   :  { %1389 = vpow2.f32 %v434_v42 }
 0x2e6   :  { %v479_v38 = vpop.permute.xlu1 %478 }
 0x2e7   :  { %499 = vmatpush.msrb.mxu3 %v479_v38 }
 0x2e9   :  { %v1388_v39 = vpop.eup %1387 }
 0x2ea   :  { %1282 = vmatmul.msk.f32.vlgmr.msrb.gmra.mxu3 %vm318_vm0, %v1388_v39  ;;  %v441_v40 = vsel %vm318_vm0, %v1388_v39, 0.0  ;;  %v1390_v44 = vpop.eup %1389  ;;  %v1369_v39 = vld [vmem:[#allocation5] ss:$0 sm:$0xff] }
 0x2eb   :  { %442 = vadd.xlane.f32.xlu0 %v441_v40  ;;  %v450_v48 = vmul.f32 %v1390_v44, %v1366_v47 }
 0x350   :  { %v440_v43 = vpop.xlane.xlu2 %439 }
 0x351   :  { %v444_v45 = vadd.f32 %v1390_v44, %v440_v43 }
 0x353   :  { %1391 = vrcp.f32 %v444_v45 }
 0x354   :  { %1393 = vpow2.f32 %v436_v46 }
 0x359   :  { %v1392_v51 = vpop.eup %1391 }
 0x35a   :  { %v1394_v54 = vpop.eup %1393 }
 0x35b   :  { %v451_v56 = vmul.f32 %v1394_v54, %v1366_v47 }
 0x35e   :  { %v443_v52 = vpop.xlane.xlu0 %442 }
 0x35f   :  { %v475_v49 = vpop.f32.mrf.mxu3  ;;  %v445_v55 = vadd.f32 %v1394_v54, %v443_v52  ;;  %v643_v52 = vld [vmem:[%s2216_s29] sm:$0xf] }
 0x360   :  { %v476_v50 = vadd.f32 %v475_v49, %v450_v48  ;;  %1287 = vmatpush.msk.msrb.mxu0 %vm655_vm8, %v643_v52 }
 0x361   :  { %1395 = vrcp.f32 %v445_v55 }
 0x362   :  { %v506_v53 = vmul.f32 %v1392_v51, %v476_v50  ;;  %1397 = vrcp.f32 %v1852_v8 }
 0x364   :  { %1283 = vmatmul.msk.f32.vlgmr.msrb.gmra.mxu1 %vm318_vm0, %v506_v53  ;;  %v1370_v53 = vld [vmem:[#allocation7] ss:$0 sm:$0xff] }
 0x367   :  { %v1396_v59 = vpop.eup %1395 }
 0x368   :  { %v1398_v9 = vpop.eup %1397 }
 0x369   :  { %v551_v10 = vmul.f32 8.0, %v1398_v9  ;;  %vm555_vm1 = vweird.f32 %v1398_v9 }
 0x36b   :  { %v552_v11 = vsub.f32 1.0, %v551_v10 }
 0x36d   :  { %v501_v57 = vpop.f32.mrf.mxu3  ;;  %v553_v12 = vmul.f32 %v1398_v9, %v552_v11 }
 0x36e   :  { %v502_v58 = vadd.f32 %v501_v57, %v451_v56 }
 0x36f   :  { %v554_v13 = vadd.f32 %v1398_v9, %v553_v12 }
 0x370   :  { %v507_v60 = vmul.f32 %v1396_v59, %v502_v58 }
 0x372   :  { %1284 = vmatmul.msk.f32.gmra.mxu1 %vm318_vm0, %v507_v60  ;;  %v1371_v60 = vld [vmem:[#allocation8] ss:$0 sm:$0xff] }
 0x3e1   :  { %v536_v62 = vpop.f32.mrf.mxu1 }
 0x3e2   :  { %v537_v63 = vadd.f32 %v1367_v61, %v536_v62 }
 0x3e4   :  { %v542_v0 = vadd.f32 %v537_v63, %v2068_v1  ;;  %v2104_v1 = vsel %vm555_vm1, %v1398_v9, %v554_v13 }
 0x3e6   :  { %v544_v3 = vsel %vm318_vm0, %v542_v0, 0.0 }
 0x3e7   :  { %545 = vadd.xlane.f32.xlu2 %v544_v3 }
 0x3ef   :  { %v539_v4 = vpop.f32.mrf.mxu1 }
 0x3f0   :  { %v540_v5 = vadd.f32 %v1367_v61, %v539_v4 }
 0x3f2   :  { %v543_v6 = vadd.f32 %v540_v5, %v2073_v2 }
 0x3f4   :  { %v547_v7 = vsel %vm318_vm0, %v543_v6, 0.0 }
 0x3f5   :  { %548 = vadd.xlane.f32.xlu2 %v547_v7 }
 0x45a   :  { %v546_v14 = vpop.xlane.xlu2 %545 }
 0x45b   :  { %v557_v15 = vmul.f32 %v2104_v1, %v546_v14 }
 0x45d   :  { %v559_v16 = vsub.f32 %v542_v0, %v557_v15 }
 0x45f   :  { %v561_v17 = vmul.f32 %v559_v16, %v559_v16 }
 0x461   :  { %v563_v2 = vsel %vm318_vm0, %v561_v17, 0.0 }
 0x462   :  { %564 = vadd.xlane.f32.xlu2 %v563_v2 }
 0x468   :  { %v549_v18 = vpop.xlane.xlu2 %548 }
 0x469   :  { %v558_v19 = vmul.f32 %v2104_v1, %v549_v18  ;;  %v742_v18 = vld [vmem:[%s2217_s0] sm:$0xff] }
 0x46a   :  { %768 = vmatpush.msra.mxu3 %v742_v18 }
 0x46b   :  { %v560_v20 = vsub.f32 %v543_v6, %v558_v19 }
 0x46d   :  { %v562_v21 = vmul.f32 %v560_v20, %v560_v20 }
 0x46f   :  { %v566_v22 = vsel %vm318_vm0, %v562_v21, 0.0 }
 0x470   :  { %567 = vadd.xlane.f32.xlu1 %v566_v22 }
 0x4d5   :  { %v565_v24 = vpop.xlane.xlu2 %564 }
 0x4d6   :  { %v569_v25 = vmul.f32 %v565_v24, %v2104_v1 }
 0x4d8   :  { %v571_v26 = vadd.f32 1e-05, %v569_v25 }
 0x4da   :  { %1399 = vrsqrt.f32 %v571_v26  ;;  %vm579_vm3 = vweird.f32 %v571_v26 }
 0x4e0   :  { %v1400_v27 = vpop.eup %1399 }
 0x4e1   :  { %v574_v28 = vmul.f32 %v1400_v27, %v571_v26  ;;  %vm580_vm2 = vweird.f32 %v1400_v27 }
 0x4e2   :  { %vm581_vm4 = vmor %vm579_vm3, %vm580_vm2 }
 0x4e3   :  { %v575_v29 = vmul.f32 %v1400_v27, %v574_v28  ;;  %v568_v30 = vpop.xlane.xlu1 %567 }
 0x4e4   :  { %v570_v31 = vmul.f32 %v568_v30, %v2104_v1 }
 0x4e5   :  { %v576_v32 = vmul.f32 0.5, %v575_v29 }
 0x4e6   :  { %v572_v33 = vadd.f32 1e-05, %v570_v31  ;;  %v1372_v31 = vld [vmem:[#allocation10] ss:$0 sm:$0xff] }
 0x4e7   :  { %v577_v34 = vsub.f32 1.5, %v576_v32 }
 0x4e8   :  { %1401 = vrsqrt.f32 %v572_v33  ;;  %vm589_vm6 = vweird.f32 %v572_v33 }
 0x4e9   :  { %v578_v35 = vmul.f32 %v1400_v27, %v577_v34  ;;  %v1373_v34 = vld [vmem:[#allocation11] ss:$0 sm:$0xff] }
 0x4eb   :  { %v582_v37 = vsel %vm581_vm4, %v1400_v27, %v578_v35 }
 0x4ec   :  { %v593_v38 = vmul.f32 %v582_v37, %v559_v16 }
 0x4ee   :  { %v1402_v40 = vpop.eup %1401  ;;  %v599_v41 = vmul.f32 %v1368_v36, %v593_v38 }
 0x4ef   :  { %v584_v42 = vmul.f32 %v1402_v40, %v572_v33  ;;  %vm590_vm5 = vweird.f32 %v1402_v40 }
 0x4f0   :  { %v605_v43 = vadd.f32 %v1369_v39, %v599_v41  ;;  %vm591_vm7 = vmor %vm589_vm6, %vm590_vm5 }
 0x4f1   :  { %v585_v44 = vmul.f32 %v1402_v40, %v584_v42 }
 0x4f2   :  { %1285 = vmatmul.msk.f32.vlgmr.msrb.gmra.mxu2 %vm318_vm0, %v605_v43 }
 0x4f3   :  { %v586_v45 = vmul.f32 0.5, %v585_v44 }
 0x4f5   :  { %v587_v46 = vsub.f32 1.5, %v586_v45 }
 0x4f7   :  { %v588_v47 = vmul.f32 %v1402_v40, %v587_v46 }
 0x4f9   :  { %v592_v48 = vsel %vm591_vm7, %v1402_v40, %v588_v47  ;;  %v1374_v47 = vld [vmem:[%s2218_s11] ss:$0 sm:$0xff] }
 0x4fa   :  { %v594_v49 = vmul.f32 %v592_v48, %v560_v20  ;;  %v1375_v48 = vld [vmem:[%s2219_s6] ss:$0 sm:$0xff] }
 0x4fc   :  { %v600_v50 = vmul.f32 %v1368_v36, %v594_v49 }
 0x4fe   :  { %v606_v51 = vadd.f32 %v1369_v39, %v600_v50 }
 0x500   :  { %1286 = vmatmul.msk.f32.gmra.mxu2 %vm318_vm0, %v606_v51 }
 0x575   :  { %v635_v54 = vpop.f32.mrf.mxu2 }
 0x576   :  { %v636_v55 = vadd.f32 %v1370_v53, %v635_v54 }
 0x578   :  { %v641_v56 = vmax.f32 %v636_v55, 0.0 }
 0x57a   :  { %1288 = vmatmul.msk.f32.vlgmr.msrb.gmra.mxu0 %vm648_vm9, %v641_v56 }
 0x583   :  { %v638_v57 = vpop.f32.mrf.mxu2 }
 0x584   :  { %v639_v58 = vadd.f32 %v1370_v53, %v638_v57 }
 0x586   :  { %v642_v59 = vmax.f32 %v639_v58, 0.0 }
 0x588   :  { %1289 = vmatmul.msk.f32.gmra.mxu0 %vm648_vm9, %v642_v59 }
 0x5f7   :  { %v676_v61 = vpop.f32.mrf.mxu0 }
 0x5f8   :  { %v677_v62 = vadd.f32 %v1371_v60, %v676_v61 }
 0x5fa   :  { %v682_v63 = vmax.f32 %v677_v62, 0.0 }
 0x5fc   :  { %v684_v0 = vadd.f32 %v682_v63, %v605_v43 }
 0x5fe   :  { %v686_v3 = vsel %vm318_vm0, %v684_v0, 0.0 }
 0x5ff   :  { %687 = vadd.xlane.f32.xlu2 %v686_v3 }
 0x605   :  { %v679_v4 = vpop.f32.mrf.mxu0 }
 0x606   :  { %v680_v5 = vadd.f32 %v1371_v60, %v679_v4 }
 0x608   :  { %v683_v6 = vmax.f32 %v680_v5, 0.0 }
 0x60a   :  { %v685_v7 = vadd.f32 %v683_v6, %v606_v51 }
 0x60c   :  { %v689_v8 = vsel %vm318_vm0, %v685_v7, 0.0 }
 0x60d   :  { %690 = vadd.xlane.f32.xlu2 %v689_v8 }
 0x672   :  { %v688_v9 = vpop.xlane.xlu2 %687 }
 0x673   :  { %v692_v10 = vmul.f32 %v688_v9, %v2104_v1 }
 0x675   :  { %v694_v11 = vsub.f32 %v684_v0, %v692_v10 }
 0x677   :  { %v696_v12 = vmul.f32 %v694_v11, %v694_v11 }
 0x679   :  { %v698_v13 = vsel %vm318_vm0, %v696_v12, 0.0 }
 0x67a   :  { %699 = vadd.xlane.f32.xlu2 %v698_v13 }
 0x680   :  { %v691_v14 = vpop.xlane.xlu2 %690 }
 0x681   :  { %v693_v15 = vmul.f32 %v691_v14, %v2104_v1 }
 0x683   :  { %v695_v16 = vsub.f32 %v685_v7, %v693_v15 }
 0x685   :  { %v697_v17 = vmul.f32 %v695_v16, %v695_v16 }
 0x687   :  { %v701_v2 = vsel %vm318_vm0, %v697_v17, 0.0 }
 0x688   :  { %702 = vadd.xlane.f32.xlu0 %v701_v2 }
 0x6ed   :  { %v700_v19 = vpop.xlane.xlu2 %699 }
 0x6ee   :  { %v704_v20 = vmul.f32 %v700_v19, %v2104_v1 }
 0x6f0   :  { %v706_v21 = vadd.f32 1e-05, %v704_v20 }
 0x6f2   :  { %1403 = vrsqrt.f32 %v706_v21  ;;  %vm714_vm11 = vweird.f32 %v706_v21 }
 0x6f8   :  { %v1404_v22 = vpop.eup %1403 }
 0x6f9   :  { %v709_v23 = vmul.f32 %v1404_v22, %v706_v21  ;;  %vm715_vm10 = vweird.f32 %v1404_v22 }
 0x6fa   :  { %vm716_vm12 = vmor %vm714_vm11, %vm715_vm10 }
 0x6fb   :  { %v710_v24 = vmul.f32 %v1404_v22, %v709_v23  ;;  %v703_v25 = vpop.xlane.xlu0 %702 }
 0x6fc   :  { %v705_v26 = vmul.f32 %v703_v25, %v2104_v1 }
 0x6fd   :  { %v711_v27 = vmul.f32 0.5, %v710_v24  ;;  %v936_v24 = vld [vmem:[%s2220_s15] sm:$0xff] }
 0x6fe   :  { %v707_v28 = vadd.f32 1e-05, %v705_v26 }
 0x6ff   :  { %v712_v29 = vsub.f32 1.5, %v711_v27 }
 0x700   :  { %1405 = vrsqrt.f32 %v707_v28  ;;  %vm724_vm14 = vweird.f32 %v707_v28 }
 0x701   :  { %v713_v30 = vmul.f32 %v1404_v22, %v712_v29 }
 0x703   :  { %v717_v32 = vsel %vm716_vm12, %v1404_v22, %v713_v30 }
 0x704   :  { %v728_v33 = vmul.f32 %v717_v32, %v694_v11 }
 0x706   :  { %v1406_v35 = vpop.eup %1405  ;;  %v734_v36 = vmul.f32 %v1372_v31, %v728_v33 }
 0x707   :  { %v719_v37 = vmul.f32 %v1406_v35, %v707_v28  ;;  %vm725_vm13 = vweird.f32 %v1406_v35 }
 0x708   :  { %v2128_v38 = vadd.f32 %v1373_v34, %v734_v36  ;;  %vm726_vm15 = vmor %vm724_vm14, %vm725_vm13 }
 0x709   :  { %v720_v39 = vmul.f32 %v1406_v35, %v719_v37 }
 0x70a   :  { %1290 = vmatmul.msk.f32.vlgmr.msra.gmra.mxu3 %vm318_vm0, %v2128_v38 }
 0x70b   :  { %v721_v40 = vmul.f32 0.5, %v720_v39 }
 0x70d   :  { %v722_v41 = vsub.f32 1.5, %v721_v40 }
 0x70f   :  { %v723_v42 = vmul.f32 %v1406_v35, %v722_v41 }
 0x711   :  { %v727_v43 = vsel %vm726_vm15, %v1406_v35, %v723_v42 }
 0x712   :  { %v729_v44 = vmul.f32 %v727_v43, %v695_v16 }
 0x714   :  { %v735_v45 = vmul.f32 %v1372_v31, %v729_v44  ;;  %v1376_v31 = vld [vmem:[%s2221_s16] ss:$0 sm:$0xff] }
 0x716   :  { %v2132_v46 = vadd.f32 %v1373_v34, %v735_v45  ;;  %v1377_v45 = vld [vmem:[%s2222_s22] ss:$0 sm:$0xff] }
 0x718   :  { %1291 = vmatmul.msk.f32.gmra.mxu3 %vm318_vm0, %v2132_v46 }
 0x78d   :  { %v770_v49 = vpop.f32.mrf.mxu3 }
 0x78e   :  { %v771_v50 = vadd.f32 %v1374_v47, %v770_v49 }
 0x790   :  { %777 = vrot.lane.b32.xlu0 %v771_v50, %s1850_s7  ;;  %v836_v51 = vmul.f32 %v1375_v48, %v771_v50 }
 0x792   :  { %v838_v52 = vsel %vm318_vm0, %v836_v51, 0.0 }
 0x793   :  { %839 = vadd.xlane.f32.xlu1 %v838_v52 }
 0x79b   :  { %v773_v53 = vpop.f32.mrf.mxu3 }
 0x79c   :  { %v774_v54 = vadd.f32 %v1374_v47, %v773_v53 }
 0x79e   :  { %804 = vrot.lane.b32.xlu2 %v774_v54, %s1850_s7  ;;  %v837_v55 = vmul.f32 %v1375_v48, %v774_v54  ;;  %v1359_v57 = vpack.i.bf16 %v774_v54, %v771_v50 }
 0x7a0   :  { %v841_v56 = vsel %vm318_vm0, %v837_v55, 0.0 }
 0x7a1   :  { %842 = vadd.xlane.f32.xlu1 %v841_v56 }
 0x7ba   :  { %1360 = vrot.lane.b32.xlu1 %v1359_v57, %s1851_s5 }
 0x7f8   :  { %v805_v58 = vpop.permute.xlu2 %804 }
 0x7f9   :  { %1294 = vmatpush.xpose.msk.msra.mxu2 %vm318_vm0, %v805_v58 }
 0x7fc   :  { %1295 = vmatmul.msk.f32.vlgmr.msra.gmra.mxu2 %vm318_vm0, %v774_v54 }
 0x802   :  { %v778_v59 = vpop.permute.xlu0 %777 }
 0x803   :  { %1292 = vmatpush.xpose.msk.msra.mxu1 %vm318_vm0, %v778_v59 }
 0x806   :  { %1293 = vmatmul.msk.f32.vlgmr.msra.gmra.mxu1 %vm318_vm0, %v771_v50  ;;  %v840_v60 = vpop.xlane.xlu1 %839 }
 0x807   :  { %v844_v12 = vmul.f32 0.35355338, %v840_v60  ;;  %962 = vmatpush.msrb.mxu1 %v936_v24 }
 0x814   :  { %v843_v61 = vpop.xlane.xlu1 %842 }
 0x815   :  { %v845_v9 = vmul.f32 0.35355338, %v843_v61 }
 0x82c   :  { %v1361_v62 = vpop.permute.xlu1 %1360 }
 0x82d   :  { %v1363_v63 = vunpack.i.h.bf16 %v1361_v62  ;;  %v1362_v0 = vunpack.i.l.bf16 %v1361_v62 }
 0x82f   :  { %901 = vmatpush.msra.mxu0 %v1362_v0  ;;  %927 = vmatpush.msrb.mxu3 %v1363_v63 }
 0x87f   :  { %v827_v3 = vpop.f32.mrf.mxu2 }
 0x880   :  { %v831_v4 = vmul.f32 0.35355338, %v827_v3 }
 0x882   :  { %v849_v5 = vsel %vm318_vm0, %v831_v4, -inf }
 0x883   :  { %850 = vmax.xlane.f32.xlu2 %v849_v5  ;;  %v800_v6 = vpop.f32.mrf.mxu1 }
 0x884   :  { %v830_v7 = vmul.f32 0.35355338, %v800_v6 }
 0x886   :  { %v846_v8 = vsel %vm318_vm0, %v830_v7, -inf }
 0x887   :  { %847 = vmax.xlane.f32.xlu0 %v846_v8 }
 0x8f6   :  { %v851_v10 = vpop.xlane.xlu2 %850 }
 0x8f7   :  { %v853_v11 = vmax.f32 %v851_v10, %v845_v9 }
 0x8f9   :  { %v855_v13 = vsub.f32 %v831_v4, %v853_v11  ;;  %v861_v14 = vsub.f32 %v845_v9, %v853_v11 }
 0x8fa   :  { %v848_v15 = vpop.xlane.xlu0 %847 }
 0x8fb   :  { %v858_v16 = vmul.f32 1.442695, %v855_v13  ;;  %v852_v17 = vmax.f32 %v848_v15, %v844_v12  ;;  %v864_v26 = vmul.f32 1.442695, %v861_v14 }
 0x8fd   :  { %1407 = vpow2.f32 %v858_v16  ;;  %v854_v2 = vsub.f32 %v830_v7, %v852_v17  ;;  %v860_v18 = vsub.f32 %v844_v12, %v852_v17  ;;  %v1378_v16 = vld [vmem:[#allocation13] ss:$0 sm:$0xff] }
 0x8ff   :  { %v856_v19 = vmul.f32 1.442695, %v854_v2  ;;  %v862_v25 = vmul.f32 1.442695, %v860_v18 }
 0x901   :  { %1409 = vpow2.f32 %v856_v19  ;;  %v1379_v19 = vld [vmem:[#allocation14] ss:$0 sm:$0xff] }
 0x902   :  { %1411 = vpow2.f32 %v862_v25 }
 0x903   :  { %v1408_v20 = vpop.eup %1407  ;;  %1413 = vpow2.f32 %v864_v26 }
 0x904   :  { %1297 = vmatmul.msk.f32.vlgmr.msrb.gmra.mxu3 %vm318_vm0, %v1408_v20  ;;  %v869_v21 = vsel %vm318_vm0, %v1408_v20, 0.0 }
 0x905   :  { %870 = vadd.xlane.f32.xlu0 %v869_v21 }
 0x907   :  { %v1410_v22 = vpop.eup %1409 }
 0x908   :  { %1296 = vmatmul.msk.f32.vlgmr.msra.gmra.mxu0 %vm318_vm0, %v1410_v22  ;;  %v866_v23 = vsel %vm318_vm0, %v1410_v22, 0.0  ;;  %v1412_v27 = vpop.eup %1411 }
 0x909   :  { %867 = vadd.xlane.f32.xlu1 %v866_v23  ;;  %v1414_v32 = vpop.eup %1413  ;;  %v878_v33 = vmul.f32 %v1412_v27, %v1376_v31 }
 0x90a   :  { %v879_v41 = vmul.f32 %v1414_v32, %v1376_v31 }
 0x978   :  { %v871_v30 = vpop.xlane.xlu0 %870 }
 0x979   :  { %v873_v34 = vadd.f32 %v1414_v32, %v871_v30  ;;  %v1380_v30 = vld [vmem:[#allocation16] ss:$0 sm:$0xff] }
 0x97c   :  { %v868_v28 = vpop.xlane.xlu1 %867 }
 0x97d   :  { %v872_v29 = vadd.f32 %v1412_v27, %v868_v28 }
 0x97f   :  { %1415 = vrcp.f32 %v872_v29  ;;  %v1064_v29 = vld [vmem:[%s2224_s12] sm:$0xf] }
 0x980   :  { %1417 = vrcp.f32 %v873_v34  ;;  %1302 = vmatpush.msk.msrb.mxu0 %vm655_vm8, %v1064_v29 }
 0x985   :  { %v903_v35 = vpop.f32.mrf.mxu0  ;;  %v1416_v37 = vpop.eup %1415 }
 0x986   :  { %v904_v36 = vadd.f32 %v903_v35, %v878_v33  ;;  %v1418_v43 = vpop.eup %1417 }
 0x987   :  { %v929_v40 = vpop.f32.mrf.mxu3 }
 0x988   :  { %v934_v39 = vmul.f32 %v1416_v37, %v904_v36  ;;  %v930_v42 = vadd.f32 %v929_v40, %v879_v41  ;;  %v1381_v37 = vld [vmem:[#allocation17] ss:$0 sm:$0xff] }
 0x98a   :  { %1298 = vmatmul.msk.f32.vlgmr.msrb.gmra.mxu1 %vm318_vm0, %v934_v39  ;;  %v935_v44 = vmul.f32 %v1418_v43, %v930_v42 }
 0x992   :  { %1299 = vmatmul.msk.f32.gmra.mxu1 %vm318_vm0, %v935_v44 }
 0xa07   :  { %v964_v47 = vpop.f32.mrf.mxu1 }
 0xa08   :  { %v965_v48 = vadd.f32 %v1377_v45, %v964_v47 }
 0xa0a   :  { %v970_v49 = vadd.f32 %v965_v48, %v2128_v38 }
 0xa0c   :  { %v972_v50 = vsel %vm318_vm0, %v970_v49, 0.0 }
 0xa0d   :  { %973 = vadd.xlane.f32.xlu2 %v972_v50 }
 0xa0f   :  { %v967_v51 = vpop.f32.mrf.mxu1 }
 0xa10   :  { %v968_v52 = vadd.f32 %v1377_v45, %v967_v51 }
 0xa12   :  { %v971_v53 = vadd.f32 %v968_v52, %v2132_v46  ;;  %v1028_v46 = vld [vmem:[%s2223_s21] sm:$0xff] }
 0xa13   :  { %1054 = vmatpush.msrb.mxu2 %v1028_v46 }
 0xa14   :  { %v975_v54 = vsel %vm318_vm0, %v971_v53, 0.0 }
 0xa15   :  { %976 = vadd.xlane.f32.xlu0 %v975_v54 }
 0xa80   :  { %v974_v55 = vpop.xlane.xlu2 %973 }
 0xa81   :  { %v978_v56 = vmul.f32 %v974_v55, %v2104_v1 }
 0xa83   :  { %v980_v57 = vsub.f32 %v970_v49, %v978_v56 }
 0xa85   :  { %v982_v58 = vmul.f32 %v980_v57, %v980_v57 }
 0xa87   :  { %v984_v59 = vsel %vm318_vm0, %v982_v58, 0.0 }
 0xa88   :  { %v977_v60 = vpop.xlane.xlu0 %976  ;;  %985 = vadd.xlane.f32.xlu2 %v984_v59 }
 0xa89   :  { %v979_v38 = vmul.f32 %v977_v60, %v2104_v1  ;;  %v1163_v60 = vld [vmem:[%s2010_s14] sm:$0xff]  ;;  %s1853_s14 = smov [#allocation23]  }
 0xa8a   :  { %1189 = vmatpush.msra.mxu3 %v1163_v60  ;;  %s1204_s4 = sshll.u32 %s1853_s14, 4  ;;  %s1205_s4 = int_to_ptr.vmem [resolvable:$true] %s1204_s4 }
 0xa8b   :  { %v981_v61 = vsub.f32 %v971_v53, %v979_v38 }
 0xa8d   :  { %v983_v62 = vmul.f32 %v981_v61, %v981_v61 }
 0xa8f   :  { %v987_v63 = vsel %vm318_vm0, %v983_v62, 0.0 }
 0xa90   :  { %988 = vadd.xlane.f32.xlu0 %v987_v63 }
 0xafb   :  { %v986_v0 = vpop.xlane.xlu2 %985 }
 0xafc   :  { %v990_v3 = vmul.f32 %v986_v0, %v2104_v1 }
 0xafe   :  { %v992_v4 = vadd.f32 1e-05, %v990_v3 }
 0xb00   :  { %1419 = vrsqrt.f32 %v992_v4  ;;  %vm1000_vm2 = vweird.f32 %v992_v4 }
 0xb03   :  { %v989_v5 = vpop.xlane.xlu0 %988 }
 0xb04   :  { %v991_v6 = vmul.f32 %v989_v5, %v2104_v1 }
 0xb06   :  { %v1420_v7 = vpop.eup %1419  ;;  %v993_v8 = vadd.f32 1e-05, %v991_v6 }
 0xb07   :  { %v995_v9 = vmul.f32 %v1420_v7, %v992_v4  ;;  %vm1001_vm1 = vweird.f32 %v1420_v7 }
 0xb08   :  { %1421 = vrsqrt.f32 %v993_v8  ;;  %vm1002_vm3 = vmor %vm1000_vm2, %vm1001_vm1  ;;  %vm1010_vm5 = vweird.f32 %v993_v8 }
 0xb09   :  { %v996_v10 = vmul.f32 %v1420_v7, %v995_v9 }
 0xb0b   :  { %v997_v11 = vmul.f32 0.5, %v996_v10 }
 0xb0d   :  { %v998_v12 = vsub.f32 1.5, %v997_v11  ;;  %v1382_v11 = vld [vmem:[#allocation19] ss:$0 sm:$0xff] }
 0xb0e   :  { %v1422_v13 = vpop.eup %1421 }
 0xb0f   :  { %v999_v14 = vmul.f32 %v1420_v7, %v998_v12  ;;  %v1005_v15 = vmul.f32 %v1422_v13, %v993_v8  ;;  %vm1011_vm4 = vweird.f32 %v1422_v13 }
 0xb10   :  { %vm1012_vm6 = vmor %vm1010_vm5, %vm1011_vm4 }
 0xb11   :  { %v1003_v17 = vsel %vm1002_vm3, %v1420_v7, %v999_v14  ;;  %v1006_v2 = vmul.f32 %v1422_v13, %v1005_v15  ;;  %v1383_v15 = vld [vmem:[#allocation20] ss:$0 sm:$0xff] }
 0xb12   :  { %v1014_v18 = vmul.f32 %v1003_v17, %v980_v57 }
 0xb13   :  { %v1007_v20 = vmul.f32 0.5, %v1006_v2 }
 0xb14   :  { %v1020_v21 = vmul.f32 %v1378_v16, %v1014_v18 }
 0xb15   :  { %v1008_v22 = vsub.f32 1.5, %v1007_v20 }
 0xb16   :  { %v1026_v23 = vadd.f32 %v1379_v19, %v1020_v21 }
 0xb17   :  { %v1009_v24 = vmul.f32 %v1422_v13, %v1008_v22 }
 0xb18   :  { %1300 = vmatmul.msk.f32.vlgmr.msrb.gmra.mxu2 %vm318_vm0, %v1026_v23 }
 0xb19   :  { %v1013_v25 = vsel %vm1012_vm6, %v1422_v13, %v1009_v24 }
 0xb1a   :  { %v1015_v26 = vmul.f32 %v1013_v25, %v981_v61 }
 0xb1c   :  { %v1021_v27 = vmul.f32 %v1378_v16, %v1015_v26 }
 0xb1e   :  { %v1027_v28 = vadd.f32 %v1379_v19, %v1021_v27 }
 0xb20   :  { %1301 = vmatmul.msk.f32.gmra.mxu2 %vm318_vm0, %v1027_v28 }
 0xb9b   :  { %v1056_v31 = vpop.f32.mrf.mxu2 }
 0xb9c   :  { %v1057_v32 = vadd.f32 %v1380_v30, %v1056_v31 }
 0xb9e   :  { %v1062_v33 = vmax.f32 %v1057_v32, 0.0 }
 0xba0   :  { %1303 = vmatmul.msk.f32.vlgmr.msrb.gmra.mxu0 %vm648_vm9, %v1062_v33 }
 0xba3   :  { %v1059_v34 = vpop.f32.mrf.mxu2 }
 0xba4   :  { %v1060_v35 = vadd.f32 %v1380_v30, %v1059_v34 }
 0xba6   :  { %v1063_v36 = vmax.f32 %v1060_v35, 0.0 }
 0xba8   :  { %1304 = vmatmul.msk.f32.gmra.mxu0 %vm648_vm9, %v1063_v36 }
 0xc1d   :  { %v1095_v39 = vpop.f32.mrf.mxu0 }
 0xc1e   :  { %v1096_v40 = vadd.f32 %v1381_v37, %v1095_v39 }
 0xc20   :  { %v1101_v41 = vmax.f32 %v1096_v40, 0.0 }
 0xc22   :  { %v1103_v42 = vadd.f32 %v1101_v41, %v1026_v23 }
 0xc24   :  { %v1105_v43 = vsel %vm318_vm0, %v1103_v42, 0.0 }
 0xc25   :  { %v1098_v44 = vpop.f32.mrf.mxu0  ;;  %1106 = vadd.xlane.f32.xlu2 %v1105_v43 }
 0xc26   :  { %v1099_v45 = vadd.f32 %v1381_v37, %v1098_v44 }
 0xc28   :  { %v1102_v47 = vmax.f32 %v1099_v45, 0.0 }
 0xc2a   :  { %v1104_v48 = vadd.f32 %v1102_v47, %v1027_v28 }
 0xc2c   :  { %v1108_v49 = vsel %vm318_vm0, %v1104_v48, 0.0 }
 0xc2d   :  { %1109 = vadd.xlane.f32.xlu0 %v1108_v49 }
 0xc98   :  { %v1107_v50 = vpop.xlane.xlu2 %1106 }
 0xc99   :  { %v1111_v51 = vmul.f32 %v1107_v50, %v2104_v1 }
 0xc9b   :  { %v1113_v52 = vsub.f32 %v1103_v42, %v1111_v51 }
 0xc9d   :  { %v1115_v53 = vmul.f32 %v1113_v52, %v1113_v52 }
 0xc9f   :  { %v1117_v54 = vsel %vm318_vm0, %v1115_v53, 0.0 }
 0xca0   :  { %v1110_v55 = vpop.xlane.xlu0 %1109  ;;  %1118 = vadd.xlane.f32.xlu2 %v1117_v54 }
 0xca1   :  { %v1112_v56 = vmul.f32 %v1110_v55, %v2104_v1 }
 0xca3   :  { %v1114_v57 = vsub.f32 %v1104_v48, %v1112_v56 }
 0xca5   :  { %v1116_v58 = vmul.f32 %v1114_v57, %v1114_v57 }
 0xca7   :  { %v1120_v59 = vsel %vm318_vm0, %v1116_v58, 0.0 }
 0xca8   :  { %1121 = vadd.xlane.f32.xlu1 %v1120_v59 }
 0xd13   :  { %v1119_v38 = vpop.xlane.xlu2 %1118 }
 0xd14   :  { %v1123_v61 = vmul.f32 %v1119_v38, %v2104_v1 }
 0xd16   :  { %v1125_v62 = vadd.f32 1e-05, %v1123_v61 }
 0xd18   :  { %1423 = vrsqrt.f32 %v1125_v62  ;;  %vm1133_vm8 = vweird.f32 %v1125_v62 }
 0xd1b   :  { %v1122_v63 = vpop.xlane.xlu1 %1121 }
 0xd1c   :  { %v1124_v46 = vmul.f32 %v1122_v63, %v2104_v1 }
 0xd1e   :  { %v1424_v0 = vpop.eup %1423  ;;  %v1126_v3 = vadd.f32 1e-05, %v1124_v46 }
 0xd1f   :  { %v1128_v4 = vmul.f32 %v1424_v0, %v1125_v62  ;;  %vm1134_vm7 = vweird.f32 %v1424_v0 }
 0xd20   :  { %1425 = vrsqrt.f32 %v1126_v3  ;;  %vm1135_vm9 = vmor %vm1133_vm8, %vm1134_vm7  ;;  %vm1143_vm11 = vweird.f32 %v1126_v3 }
 0xd21   :  { %v1129_v5 = vmul.f32 %v1424_v0, %v1128_v4 }
 0xd23   :  { %v1130_v6 = vmul.f32 0.5, %v1129_v5 }
 0xd25   :  { %v1131_v7 = vsub.f32 1.5, %v1130_v6 }
 0xd26   :  { %v1426_v8 = vpop.eup %1425 }
 0xd27   :  { %v1132_v9 = vmul.f32 %v1424_v0, %v1131_v7  ;;  %v1138_v10 = vmul.f32 %v1426_v8, %v1126_v3  ;;  %vm1144_vm10 = vweird.f32 %v1426_v8 }
 0xd28   :  { %vm1145_vm12 = vmor %vm1143_vm11, %vm1144_vm10 }
 0xd29   :  { %v1136_v12 = vsel %vm1135_vm9, %v1424_v0, %v1132_v9  ;;  %v1139_v13 = vmul.f32 %v1426_v8, %v1138_v10 }
 0xd2a   :  { %v1147_v14 = vmul.f32 %v1136_v12, %v1113_v52 }
 0xd2b   :  { %v1140_v16 = vmul.f32 0.5, %v1139_v13 }
 0xd2c   :  { %v1153_v1 = vmul.f32 %v1382_v11, %v1147_v14 }
 0xd2d   :  { %v1141_v17 = vsub.f32 1.5, %v1140_v16 }
 0xd2e   :  { %v1159_v2 = vadd.f32 %v1383_v15, %v1153_v1 }
 0xd2f   :  { %v1142_v18 = vmul.f32 %v1426_v8, %v1141_v17 }
 0xd30   :  { %1305 = vmatmul.msk.f32.vlgmr.msra.gmra.mxu3 %vm318_vm0, %v1159_v2  ;;  %1161 = vst.msk [vmem:[#allocation23] sm:$0xff] %vm318_vm0, %v1159_v2 }
 0xd31   :  { %v1146_v19 = vsel %vm1145_vm12, %v1426_v8, %v1142_v18 }
 0xd32   :  { %v1148_v20 = vmul.f32 %v1146_v19, %v1114_v57 }
 0xd34   :  { %v1154_v21 = vmul.f32 %v1382_v11, %v1148_v20 }
 0xd36   :  { %v1160_v22 = vadd.f32 %v1383_v15, %v1154_v21 }
 0xd38   :  { %1162 = vst.msk [vmem:[#allocation23 + $0x8] sm:$0xff] %vm318_vm0, %v1160_v22  ;;  %1306 = vmatmul.msk.f32.gmra.mxu3 %vm318_vm0, %v1160_v22 }
 0xd39   :  { %1762 = shalt.err (!%p1759_p13)
}
 0xd3a   :  { %s1854_s3 = smov 128   ;;  %s1855_s27 = smov 8   ;;  %v1384_v23 = vld [vmem:[#allocation22] ss:$0 sm:$0xff]  ;;  %vm1197_vm0 = vcmask 130048  }
 0xd3b   :  { %1212 = dma.vmem_to_hbm [thread:$0]  %s1205_s4, 256, %s1207_s18, [#allocation4], %s1854_s3, %s1854_s3, %s1855_s27  }
 0xd3c   :  { %s1856_s1 = smov [#allocation24]   ;;  %s1219_s8 = sshll.u32 %s2025_s13, 4  ;;  %s1220_s8 = int_to_ptr.hbm [resolvable:$true] %s1219_s8 }
 0xd3d   :  { %s1217_s24 = sshll.u32 %s1856_s1, 4  ;;  %s1775_s17 = sshra.s32 %s1220_s8, 4  ;;  %s1218_s24 = int_to_ptr.vmem [resolvable:$true] %s1217_s24  ;;  %s1776_s17 = int_to_ptr.hbm [resolvable:$true] %s1775_s17 }
 0xd3e   :  { %s1777_s2 = scalar_lea.hbm %s1776_s17, 16  ;;  %s1779_s25 = scalar_lea.hbm %s2025_s13, 16 }
 0xd3f   :  { %p1778_p0 = scmp.ne.s32.totalorder %s1776_s17, %s1777_s2  ;;  %p1780_p1 = scmp.lt.s32.totalorder %s1776_s17, %s2025_s13 }
 0xd40   :  { %p1781_p2 = scmp.lt.s32.totalorder %s1779_s25, %s1777_s2 }
 0xd42   :  { %p1782_p3 = por %p1781_p2, %p1780_p1 }
 0xd44   :  { %p1783_p4 = pnand %p1782_p3, %p1778_p0 }
 0xdb3   :  { %v1191_v24 = vpop.f32.mrf.mxu3 }
 0xdb4   :  { %v1192_v25 = vadd.f32 %v1384_v23, %v1191_v24 }
 0xdb6   :  { %1198 = vst.msk [vmem:[#allocation24] sm:$0xff] %vm1197_vm0, %v1192_v25 }
 0xdbb   :  { %v1194_v26 = vpop.f32.mrf.mxu3 }
 0xdbc   :  { %v1195_v27 = vadd.f32 %v1384_v23, %v1194_v26 }
 0xdbe   :  { %1199 = vst.msk [vmem:[#allocation24 + $0x8] sm:$0xff] %vm1197_vm0, %v1195_v27 }
 0xdbf   :  { %1786 = shalt.err (!%p1783_p4)
}
 0xdc0   :  { %1225 = dma.vmem_to_hbm [thread:$0]  %s1218_s24, 256, %s1220_s8, [#allocation25], %s1854_s3, %s1854_s3, %s1855_s27  }
 0xdc1   :  { %1801 = dma.done.wait [#allocation4], 256  }
 0xdc2   :  { %1802 = vsyncadd [#allocation4], 4294967040 }
 0xdc3   :  { %1803 = dma.done.wait [#allocation25], 256  }
 0xdc4   :  { %1804 = vsyncadd [#allocation25], 4294967040 }
 0xdc5   :  { %1234 = vsyncpa [#allocation3], 1 }
 0xdc6   :  { %1235 = vsyncpa [#allocation6], 1 }
 0xdc7   :  { %1236 = vsyncpa [#allocation9], 1 }
 0xdc8   :  { %1237 = vsyncpa [#allocation12], 1 }
 0xdc9   :  { %1238 = vsyncpa [#allocation15], 1 }
 0xdca   :  { %1239 = vsyncpa [#allocation18], 1 }
 0xdcb   :  { %1240 = vsyncpa [#allocation21], 1 }
 0xdcc   :  { %1241 = vsyncpa [#allocation4], 1 }
 0xdcd   :  { %1242 = vsyncpa [#allocation25], 1 }

</bundles_post_ra>
